<compile_context>
chip_gen: v7x
topology: tpu7x:2x2x1
jax: 0.10.0
libtpu: 0.0.40
codegen_flags: <defaults>
</compile_context>

<pallas_src>
import functools

import jax
import jax.numpy as jnp
import numpy as np
from jax.experimental import pallas as pl
from jax.experimental.pallas import tpu as pltpu


def _im2col(pad_ref, H, W, C):
    """(H*W, 9*C) patch matrix for a 3x3 'same' conv, read from a zero-border
    (H+2, W+2, C) VMEM scratch.  One concat feeding one big MXU matmul."""
    blocks = []
    for dy in range(3):
        for dx in range(3):
            blocks.append(pad_ref[dy:dy + H, dx:dx + W, :].reshape(H * W, C))
    return jnp.concatenate(blocks, axis=1)


def _stem_kernel(x_ref, w_ref, s_ref, t_ref, o_ref, pad_s):
    # x_ref : (1, H, W, Cin) f32      w_ref : (9, Cin, C) f32
    # s_ref, t_ref : (1, C) f32       o_ref : (1, H, W, C) f32
    # pad_s : (H+2, W+2, Cin) f32 persistent VMEM scratch
    H, W, C = o_ref.shape[1], o_ref.shape[2], o_ref.shape[3]
    Cin = x_ref.shape[3]

    # Zero + fill the padded scratch every step (cheap; megacore-safe since each
    # core re-initializes its own scratch).  Replaces wrapper-side HBM jnp.pad.
    pad_s[...] = jnp.zeros_like(pad_s)
    pad_s[1:H + 1, 1:W + 1, :] = x_ref[0]

    # Cin is tiny (4), so this conv is <2% of the total work: keep the simple
    # 9-tap accumulate (36-deep contraction) in f32.
    acc = jnp.zeros((H * W, C), jnp.float32)
    for dy in range(3):
        for dx in range(3):
            patch = pad_s[dy:dy + H, dx:dx + W, :].reshape(H * W, Cin)
            acc = acc + jnp.dot(patch, w_ref[dy * 3 + dx],
                                preferred_element_type=jnp.float32)

    y = jnp.maximum(acc * s_ref[...] + t_ref[...], 0.0)
    o_ref[0] = y.reshape(H, W, C)


def _resblock_kernel(x_ref, w1_ref, s1_ref, t1_ref, w2_ref, s2_ref, t2_ref,
                     o_ref, pad1_s, pad2_s, *, pool):
    # x_ref  : (1, H, W, C) f32
    # w*_ref : (9*C, C) bf16 (HWIO weights reshaped in the wrapper)
    # s*, t* : (1, C) f32 folded conv-bias + eval-mode BN
    # o_ref  : (1, H, W, C) f32, or (1, 1, C) f32 when pool=True
    # pad*_s : (H+2, W+2, C) bf16 persistent VMEM scratch (zero border)
    H, W, C = x_ref.shape[1], x_ref.shape[2], x_ref.shape[3]
    x = x_ref[0]                                              # (H, W, C) f32

    # ---- conv1 + BN1 + ReLU : single fused im2col matmul (bf16 -> f32 acc) ---
    pad1_s[...] = jnp.zeros_like(pad1_s)
    pad1_s[1:H + 1, 1:W + 1, :] = x.astype(pad1_s.dtype)
    p1 = _im2col(pad1_s, H, W, C)                             # (H*W, 9C) bf16
    h1 = jnp.dot(p1, w1_ref[...], preferred_element_type=jnp.float32)
    h1 = jnp.maximum(h1 * s1_ref[...] + t1_ref[...], 0.0)     # (H*W, C) f32

    # ---- conv2 + BN2, reading from the second padded scratch (no jnp.pad) ----
    pad2_s[...] = jnp.zeros_like(pad2_s)
    pad2_s[1:H + 1, 1:W + 1, :] = h1.reshape(H, W, C).astype(pad2_s.dtype)
    p2 = _im2col(pad2_s, H, W, C)
    h2 = jnp.dot(p2, w2_ref[...], preferred_element_type=jnp.float32)
    h2 = h2 * s2_ref[...] + t2_ref[...]

    # ---- residual add + ReLU (f32) ------------------------------------------
    out = jnp.maximum(h2 + x.reshape(H * W, C), 0.0)

    if pool:
        # Fused AdaptiveAvgPool2d((1,1)): only the (1, C) mean leaves the kernel.
        o_ref[0] = jnp.mean(out, axis=0, keepdims=True)
    else:
        o_ref[0] = out.reshape(H, W, C)


def local_feature_pallas(x_nchw, params):
    """x_nchw: (N, Cin, H, W) f32.  Returns pooled features (N, C)."""
    (w_stem, s_stem, t_stem), blocks = params
    N, Cin, H, W = x_nchw.shape
    C = s_stem.shape[0]

    x = jnp.transpose(x_nchw, (0, 2, 3, 1))        # NHWC; no HBM zero-padding

    cparams = pltpu.CompilerParams(
        dimension_semantics=("parallel",),
        vmem_limit_bytes=32 * 1024 * 1024)         # explicit budget (v7x-safe)

    # ---------------- stem: conv3x3 (Cin -> C) + BN + ReLU -------------------
    h = pl.pallas_call(
        _stem_kernel,
        out_shape=jax.ShapeDtypeStruct((N, H, W, C), jnp.float32),
        grid=(N,),
        in_specs=[
            pl.BlockSpec((1, H, W, Cin), lambda n: (n, 0, 0, 0)),
            pl.BlockSpec((9, Cin, C), lambda n: (0, 0, 0)),
            pl.BlockSpec((1, C), lambda n: (0, 0)),
            pl.BlockSpec((1, C), lambda n: (0, 0)),
        ],
        out_specs=pl.BlockSpec((1, H, W, C), lambda n: (n, 0, 0, 0)),
        scratch_shapes=[pltpu.VMEM((H + 2, W + 2, Cin), jnp.float32)],
        compiler_params=cparams,
    )(x, w_stem.reshape(9, Cin, C), s_stem.reshape(1, C), t_stem.reshape(1, C))

    # -------- residual blocks; the last one also does the global pool --------
    for i, ((w1, s1, t1), (w2, s2, t2)) in enumerate(blocks):
        last = i == len(blocks) - 1
        if last:
            out_shape = jax.ShapeDtypeStruct((N, 1, C), jnp.float32)
            out_spec = pl.BlockSpec((1, 1, C), lambda n: (n, 0, 0))
        else:
            out_shape = jax.ShapeDtypeStruct((N, H, W, C), jnp.float32)
            out_spec = pl.BlockSpec((1, H, W, C), lambda n: (n, 0, 0, 0))

        h = pl.pallas_call(
            functools.partial(_resblock_kernel, pool=last),
            out_shape=out_shape,
            grid=(N,),
            in_specs=[
                pl.BlockSpec((1, H, W, C), lambda n: (n, 0, 0, 0)),
                pl.BlockSpec((9 * C, C), lambda n: (0, 0)),
                pl.BlockSpec((1, C), lambda n: (0, 0)),
                pl.BlockSpec((1, C), lambda n: (0, 0)),
                pl.BlockSpec((9 * C, C), lambda n: (0, 0)),
                pl.BlockSpec((1, C), lambda n: (0, 0)),
                pl.BlockSpec((1, C), lambda n: (0, 0)),
            ],
            out_specs=out_spec,
            scratch_shapes=[pltpu.VMEM((H + 2, W + 2, C), jnp.bfloat16),
                            pltpu.VMEM((H + 2, W + 2, C), jnp.bfloat16)],
            compiler_params=cparams,
        )(h,
          w1.reshape(9 * C, C), s1.reshape(1, C), t1.reshape(1, C),
          w2.reshape(9 * C, C), s2.reshape(1, C), t2.reshape(1, C))

    return h.reshape(N, C)


def make_params(in_channels, out_channels, num_res_blocks, key):
    """Deterministic params mirroring the module; conv bias + eval-BN folded."""
    C = out_channels
    eps = 1e-5

    def conv_bn(k, cin, cout, g_lo, g_hi, w_dtype):
        kw, kb = jax.random.split(k)
        fan_in = cin * 9
        # conv weights in HWIO (PyTorch OIHW transposed (2, 3, 1, 0) conceptually)
        w = jax.random.normal(kw, (3, 3, cin, cout), jnp.float32) / np.sqrt(fan_in)
        b = jax.random.normal(kb, (cout,), jnp.float32) * 0.05
        gamma = jnp.linspace(g_lo, g_hi, cout, dtype=jnp.float32)
        beta = jnp.linspace(-0.1, 0.1, cout, dtype=jnp.float32)
        mean = jnp.zeros((cout,), jnp.float32)    # running_mean
        var = jnp.ones((cout,), jnp.float32)      # running_var
        s = gamma / jnp.sqrt(var + eps)
        t = (b - mean) * s + beta
        return w.astype(w_dtype), s, t

    keys = jax.random.split(key, 1 + num_res_blocks)
    stem = conv_bn(keys[0], in_channels, C, 0.5, 1.5, jnp.float32)
    blocks = []
    for i in range(num_res_blocks):
        k1, k2 = jax.random.split(keys[1 + i])
        blocks.append((conv_bn(k1, C, C, 0.9, 1.1, jnp.bfloat16),
                       conv_bn(k2, C, C, 1.1, 0.9, jnp.bfloat16)))
    return stem, blocks


def local_feature_ref(x_nchw, params):
    """Pure-JAX reference with the same folded-BN / mixed-precision semantics."""
    (w_stem, s_stem, t_stem), blocks = params
    x = jnp.transpose(x_nchw, (0, 2, 3, 1))

    def conv(v, w):
        return jax.lax.conv_general_dilated(
            v.astype(w.dtype), w, (1, 1), "SAME",
            dimension_numbers=("NHWC", "HWIO", "NHWC"),
            preferred_element_type=jnp.float32)

    h = jnp.maximum(conv(x, w_stem) * s_stem + t_stem, 0.0)
    for (w1, s1, t1), (w2, s2, t2) in blocks:
        r = h
        o = jnp.maximum(conv(h, w1) * s1 + t1, 0.0)
        o = conv(o, w2) * s2 + t2
        h = jnp.maximum(o + r, 0.0)
    return jnp.mean(h, axis=(1, 2))


if __name__ == "__main__":
    in_channels, out_channels, num_res_blocks = 4, 128, 2
    N, H, W = 2, 16, 16

    key = jax.random.PRNGKey(0)
    k_x, k_p = jax.random.split(key)
    x = jax.random.normal(k_x, (N, in_channels, H, W), jnp.float32)   # NCHW
    params = make_params(in_channels, out_channels, num_res_blocks, k_p)

    out = local_feature_pallas(x, params)
    out = jax.block_until_ready(out)
    assert out.shape == (N, out_channels)

    ref = local_feature_ref(x, params)
    # bf16 conv operands (f32 accumulation) on both sides -> loose-ish tolerance.
    np.testing.assert_allclose(np.asarray(out), np.asarray(ref),
                               rtol=2e-2, atol=2e-2)
    print("KERNEL_OK")
</pallas_src>

<mosaic_0001>
module attributes {stable_mosaic.version = 11 : i64} {
  func.func @_stem_kernel(%arg0: i32, %arg1: memref<1x16x16x4xf32, #tpu.memory_space<vmem>>, %arg2: memref<9x4x128xf32, #tpu.memory_space<vmem>>, %arg3: memref<1x128xf32, #tpu.memory_space<vmem>>, %arg4: memref<1x128xf32, #tpu.memory_space<vmem>>, %arg5: memref<1x16x16x128xf32, #tpu.memory_space<vmem>>, %arg6: memref<18x18x4xf32, #tpu.memory_space<vmem>>) attributes {dimension_semantics = [#tpu.dimension_semantics<parallel>], iteration_bounds = array<i64: 2>, scalar_prefetch = 0 : i64, scratch_operands = 1 : i64, tpu.core_type = #tpu.core_type<tc>, window_params = [{transform_indices = @transform_0, window_bounds = array<i64: 1, 16, 16, 4>}, {pipeline_mode = #tpu.pipeline_mode<synchronous>, transform_indices = @transform_1, window_bounds = array<i64: 9, 4, 128>}, {pipeline_mode = #tpu.pipeline_mode<synchronous>, transform_indices = @transform_2, window_bounds = array<i64: 1, 128>}, {pipeline_mode = #tpu.pipeline_mode<synchronous>, transform_indices = @transform_3, window_bounds = array<i64: 1, 128>}, {transform_indices = @transform_4, window_bounds = array<i64: 1, 16, 16, 128>}]} {
    %cst = arith.constant 0.000000e+00 : f32
    %0 = vector.broadcast %cst : f32 to vector<18x18x4xf32>
    %c0 = arith.constant 0 : index
    %c0_0 = arith.constant 0 : index
    %c0_1 = arith.constant 0 : index
    %1 = vector.load %arg6[%c0, %c0_0, %c0_1] : memref<18x18x4xf32, #tpu.memory_space<vmem>>, vector<18x18x4xf32>
    tpu.vector_store %arg6[%c0, %c0_0, %c0_1], %0 {strides = array<i32>} : memref<18x18x4xf32, #tpu.memory_space<vmem>>, vector<18x18x4xf32>,
    %c0_2 = arith.constant 0 : index
    %c0_3 = arith.constant 0 : index
    %c0_4 = arith.constant 0 : index
    %c0_5 = arith.constant 0 : index
    %2 = vector.load %arg1[%c0_2, %c0_3, %c0_4, %c0_5] : memref<1x16x16x4xf32, #tpu.memory_space<vmem>>, vector<1x16x16x4xf32>
    %3 = vector.shape_cast %2 : vector<1x16x16x4xf32> to vector<16x16x4xf32>
    %c1 = arith.constant 1 : index
    %c1_6 = arith.constant 1 : index
    %c0_7 = arith.constant 0 : index
    %4 = vector.load %arg6[%c1, %c1_6, %c0_7] : memref<18x18x4xf32, #tpu.memory_space<vmem>>, vector<16x16x4xf32>
    tpu.vector_store %arg6[%c1, %c1_6, %c0_7], %3 {strides = array<i32>} : memref<18x18x4xf32, #tpu.memory_space<vmem>>, vector<16x16x4xf32>,
    %cst_8 = arith.constant 0.000000e+00 : f32
    %5 = vector.broadcast %cst_8 : f32 to vector<256x128xf32>
    %c0_9 = arith.constant 0 : index
    %c0_10 = arith.constant 0 : index
    %c0_11 = arith.constant 0 : index
    %6 = vector.load %arg6[%c0_9, %c0_10, %c0_11] : memref<18x18x4xf32, #tpu.memory_space<vmem>>, vector<16x16x4xf32>
    %7 = vector.shape_cast %6 : vector<16x16x4xf32> to vector<256x4xf32>
    %c0_12 = arith.constant 0 : index
    %c0_13 = arith.constant 0 : index
    %c0_14 = arith.constant 0 : index
    %8 = vector.load %arg2[%c0_12, %c0_13, %c0_14] : memref<9x4x128xf32, #tpu.memory_space<vmem>>, vector<1x4x128xf32>
    %9 = vector.shape_cast %8 : vector<1x4x128xf32> to vector<4x128xf32>
    %cst_15 = arith.constant dense<0.000000e+00> : vector<256x128xf32>
    %10 = tpu.matmul %7, %9, %cst_15 {dimension_numbers = #tpu.dot_dimension_numbers<[1], [0], [0], [1], [0, 0, 1, 1], [], []>} : vector<256x4xf32>, vector<4x128xf32>, vector<256x128xf32> -> vector<256x128xf32>
    %11 = arith.addf %5, %10 : vector<256x128xf32>
    %c0_16 = arith.constant 0 : index
    %c1_17 = arith.constant 1 : index
    %c0_18 = arith.constant 0 : index
    %12 = vector.load %arg6[%c0_16, %c1_17, %c0_18] : memref<18x18x4xf32, #tpu.memory_space<vmem>>, vector<16x16x4xf32>
    %13 = vector.shape_cast %12 : vector<16x16x4xf32> to vector<256x4xf32>
    %c1_19 = arith.constant 1 : index
    %c0_20 = arith.constant 0 : index
    %c0_21 = arith.constant 0 : index
    %14 = vector.load %arg2[%c1_19, %c0_20, %c0_21] : memref<9x4x128xf32, #tpu.memory_space<vmem>>, vector<1x4x128xf32>
    %15 = vector.shape_cast %14 : vector<1x4x128xf32> to vector<4x128xf32>
    %cst_22 = arith.constant dense<0.000000e+00> : vector<256x128xf32>
    %16 = tpu.matmul %13, %15, %cst_22 {dimension_numbers = #tpu.dot_dimension_numbers<[1], [0], [0], [1], [0, 0, 1, 1], [], []>} : vector<256x4xf32>, vector<4x128xf32>, vector<256x128xf32> -> vector<256x128xf32>
    %17 = arith.addf %11, %16 : vector<256x128xf32>
    %c0_23 = arith.constant 0 : index
    %c2 = arith.constant 2 : index
    %c0_24 = arith.constant 0 : index
    %18 = vector.load %arg6[%c0_23, %c2, %c0_24] : memref<18x18x4xf32, #tpu.memory_space<vmem>>, vector<16x16x4xf32>
    %19 = vector.shape_cast %18 : vector<16x16x4xf32> to vector<256x4xf32>
    %c2_25 = arith.constant 2 : index
    %c0_26 = arith.constant 0 : index
    %c0_27 = arith.constant 0 : index
    %20 = vector.load %arg2[%c2_25, %c0_26, %c0_27] : memref<9x4x128xf32, #tpu.memory_space<vmem>>, vector<1x4x128xf32>
    %21 = vector.shape_cast %20 : vector<1x4x128xf32> to vector<4x128xf32>
    %cst_28 = arith.constant dense<0.000000e+00> : vector<256x128xf32>
    %22 = tpu.matmul %19, %21, %cst_28 {dimension_numbers = #tpu.dot_dimension_numbers<[1], [0], [0], [1], [0, 0, 1, 1], [], []>} : vector<256x4xf32>, vector<4x128xf32>, vector<256x128xf32> -> vector<256x128xf32>
    %23 = arith.addf %17, %22 : vector<256x128xf32>
    %c1_29 = arith.constant 1 : index
    %c0_30 = arith.constant 0 : index
    %c0_31 = arith.constant 0 : index
    %24 = vector.load %arg6[%c1_29, %c0_30, %c0_31] : memref<18x18x4xf32, #tpu.memory_space<vmem>>, vector<16x16x4xf32>
    %25 = vector.shape_cast %24 : vector<16x16x4xf32> to vector<256x4xf32>
    %c3 = arith.constant 3 : index
    %c0_32 = arith.constant 0 : index
    %c0_33 = arith.constant 0 : index
    %26 = vector.load %arg2[%c3, %c0_32, %c0_33] : memref<9x4x128xf32, #tpu.memory_space<vmem>>, vector<1x4x128xf32>
    %27 = vector.shape_cast %26 : vector<1x4x128xf32> to vector<4x128xf32>
    %cst_34 = arith.constant dense<0.000000e+00> : vector<256x128xf32>
    %28 = tpu.matmul %25, %27, %cst_34 {dimension_numbers = #tpu.dot_dimension_numbers<[1], [0], [0], [1], [0, 0, 1, 1], [], []>} : vector<256x4xf32>, vector<4x128xf32>, vector<256x128xf32> -> vector<256x128xf32>
    %29 = arith.addf %23, %28 : vector<256x128xf32>
    %c1_35 = arith.constant 1 : index
    %c1_36 = arith.constant 1 : index
    %c0_37 = arith.constant 0 : index
    %30 = vector.load %arg6[%c1_35, %c1_36, %c0_37] : memref<18x18x4xf32, #tpu.memory_space<vmem>>, vector<16x16x4xf32>
    %31 = vector.shape_cast %30 : vector<16x16x4xf32> to vector<256x4xf32>
    %c4 = arith.constant 4 : index
    %c0_38 = arith.constant 0 : index
    %c0_39 = arith.constant 0 : index
    %32 = vector.load %arg2[%c4, %c0_38, %c0_39] : memref<9x4x128xf32, #tpu.memory_space<vmem>>, vector<1x4x128xf32>
    %33 = vector.shape_cast %32 : vector<1x4x128xf32> to vector<4x128xf32>
    %cst_40 = arith.constant dense<0.000000e+00> : vector<256x128xf32>
    %34 = tpu.matmul %31, %33, %cst_40 {dimension_numbers = #tpu.dot_dimension_numbers<[1], [0], [0], [1], [0, 0, 1, 1], [], []>} : vector<256x4xf32>, vector<4x128xf32>, vector<256x128xf32> -> vector<256x128xf32>
    %35 = arith.addf %29, %34 : vector<256x128xf32>
    %c1_41 = arith.constant 1 : index
    %c2_42 = arith.constant 2 : index
    %c0_43 = arith.constant 0 : index
    %36 = vector.load %arg6[%c1_41, %c2_42, %c0_43] : memref<18x18x4xf32, #tpu.memory_space<vmem>>, vector<16x16x4xf32>
    %37 = vector.shape_cast %36 : vector<16x16x4xf32> to vector<256x4xf32>
    %c5 = arith.constant 5 : index
    %c0_44 = arith.constant 0 : index
    %c0_45 = arith.constant 0 : index
    %38 = vector.load %arg2[%c5, %c0_44, %c0_45] : memref<9x4x128xf32, #tpu.memory_space<vmem>>, vector<1x4x128xf32>
    %39 = vector.shape_cast %38 : vector<1x4x128xf32> to vector<4x128xf32>
    %cst_46 = arith.constant dense<0.000000e+00> : vector<256x128xf32>
    %40 = tpu.matmul %37, %39, %cst_46 {dimension_numbers = #tpu.dot_dimension_numbers<[1], [0], [0], [1], [0, 0, 1, 1], [], []>} : vector<256x4xf32>, vector<4x128xf32>, vector<256x128xf32> -> vector<256x128xf32>
    %41 = arith.addf %35, %40 : vector<256x128xf32>
    %c2_47 = arith.constant 2 : index
    %c0_48 = arith.constant 0 : index
    %c0_49 = arith.constant 0 : index
    %42 = vector.load %arg6[%c2_47, %c0_48, %c0_49] : memref<18x18x4xf32, #tpu.memory_space<vmem>>, vector<16x16x4xf32>
    %43 = vector.shape_cast %42 : vector<16x16x4xf32> to vector<256x4xf32>
    %c6 = arith.constant 6 : index
    %c0_50 = arith.constant 0 : index
    %c0_51 = arith.constant 0 : index
    %44 = vector.load %arg2[%c6, %c0_50, %c0_51] : memref<9x4x128xf32, #tpu.memory_space<vmem>>, vector<1x4x128xf32>
    %45 = vector.shape_cast %44 : vector<1x4x128xf32> to vector<4x128xf32>
    %cst_52 = arith.constant dense<0.000000e+00> : vector<256x128xf32>
    %46 = tpu.matmul %43, %45, %cst_52 {dimension_numbers = #tpu.dot_dimension_numbers<[1], [0], [0], [1], [0, 0, 1, 1], [], []>} : vector<256x4xf32>, vector<4x128xf32>, vector<256x128xf32> -> vector<256x128xf32>
    %47 = arith.addf %41, %46 : vector<256x128xf32>
    %c2_53 = arith.constant 2 : index
    %c1_54 = arith.constant 1 : index
    %c0_55 = arith.constant 0 : index
    %48 = vector.load %arg6[%c2_53, %c1_54, %c0_55] : memref<18x18x4xf32, #tpu.memory_space<vmem>>, vector<16x16x4xf32>
    %49 = vector.shape_cast %48 : vector<16x16x4xf32> to vector<256x4xf32>
    %c7 = arith.constant 7 : index
    %c0_56 = arith.constant 0 : index
    %c0_57 = arith.constant 0 : index
    %50 = vector.load %arg2[%c7, %c0_56, %c0_57] : memref<9x4x128xf32, #tpu.memory_space<vmem>>, vector<1x4x128xf32>
    %51 = vector.shape_cast %50 : vector<1x4x128xf32> to vector<4x128xf32>
    %cst_58 = arith.constant dense<0.000000e+00> : vector<256x128xf32>
    %52 = tpu.matmul %49, %51, %cst_58 {dimension_numbers = #tpu.dot_dimension_numbers<[1], [0], [0], [1], [0, 0, 1, 1], [], []>} : vector<256x4xf32>, vector<4x128xf32>, vector<256x128xf32> -> vector<256x128xf32>
    %53 = arith.addf %47, %52 : vector<256x128xf32>
    %c2_59 = arith.constant 2 : index
    %c2_60 = arith.constant 2 : index
    %c0_61 = arith.constant 0 : index
    %54 = vector.load %arg6[%c2_59, %c2_60, %c0_61] : memref<18x18x4xf32, #tpu.memory_space<vmem>>, vector<16x16x4xf32>
    %55 = vector.shape_cast %54 : vector<16x16x4xf32> to vector<256x4xf32>
    %c8 = arith.constant 8 : index
    %c0_62 = arith.constant 0 : index
    %c0_63 = arith.constant 0 : index
    %56 = vector.load %arg2[%c8, %c0_62, %c0_63] : memref<9x4x128xf32, #tpu.memory_space<vmem>>, vector<1x4x128xf32>
    %57 = vector.shape_cast %56 : vector<1x4x128xf32> to vector<4x128xf32>
    %cst_64 = arith.constant dense<0.000000e+00> : vector<256x128xf32>
    %58 = tpu.matmul %55, %57, %cst_64 {dimension_numbers = #tpu.dot_dimension_numbers<[1], [0], [0], [1], [0, 0, 1, 1], [], []>} : vector<256x4xf32>, vector<4x128xf32>, vector<256x128xf32> -> vector<256x128xf32>
    %59 = arith.addf %53, %58 : vector<256x128xf32>
    %c0_65 = arith.constant 0 : index
    %c0_66 = arith.constant 0 : index
    %60 = vector.load %arg3[%c0_65, %c0_66] : memref<1x128xf32, #tpu.memory_space<vmem>>, vector<1x128xf32>
    %61 = vector.broadcast %60 : vector<1x128xf32> to vector<256x128xf32>
    %62 = arith.mulf %59, %61 : vector<256x128xf32>
    %c0_67 = arith.constant 0 : index
    %c0_68 = arith.constant 0 : index
    %63 = vector.load %arg4[%c0_67, %c0_68] : memref<1x128xf32, #tpu.memory_space<vmem>>, vector<1x128xf32>
    %64 = vector.broadcast %63 : vector<1x128xf32> to vector<256x128xf32>
    %65 = arith.addf %62, %64 : vector<256x128xf32>
    %cst_69 = arith.constant 0.000000e+00 : f32
    %66 = vector.broadcast %cst_69 : f32 to vector<256x128xf32>
    %67 = arith.maximumf %65, %66 : vector<256x128xf32>
    %68 = vector.shape_cast %67 : vector<256x128xf32> to vector<16x16x128xf32>
    %c0_70 = arith.constant 0 : index
    %c0_71 = arith.constant 0 : index
    %c0_72 = arith.constant 0 : index
    %c0_73 = arith.constant 0 : index
    %69 = vector.load %arg5[%c0_70, %c0_71, %c0_72, %c0_73] : memref<1x16x16x128xf32, #tpu.memory_space<vmem>>, vector<1x16x16x128xf32>
    %70 = vector.shape_cast %69 : vector<1x16x16x128xf32> to vector<16x16x128xf32>
    %71 = vector.shape_cast %68 : vector<16x16x128xf32> to vector<1x16x16x128xf32>
    tpu.vector_store %arg5[%c0_70, %c0_71, %c0_72, %c0_73], %71 {strides = array<i32>} : memref<1x16x16x128xf32, #tpu.memory_space<vmem>>, vector<1x16x16x128xf32>,
    return
  }
  func.func @transform_0(%arg0: i32) -> (i32, i32, i32, i32) {
    %c0_i32 = arith.constant 0 : i32
    %c0_i32_0 = arith.constant 0 : i32
    %c0_i32_1 = arith.constant 0 : i32
    %c0_i32_2 = arith.constant 0 : i32
    return %arg0, %c0_i32, %c0_i32_0, %c0_i32_1 : i32, i32, i32, i32
  }
  func.func @transform_1(%arg0: i32) -> (i32, i32, i32) {
    %c0_i32 = arith.constant 0 : i32
    %c0_i32_0 = arith.constant 0 : i32
    %c0_i32_1 = arith.constant 0 : i32
    %c0_i32_2 = arith.constant 0 : i32
    return %c0_i32, %c0_i32_0, %c0_i32_1 : i32, i32, i32
  }
  func.func @transform_2(%arg0: i32) -> (i32, i32) {
    %c0_i32 = arith.constant 0 : i32
    %c0_i32_0 = arith.constant 0 : i32
    %c0_i32_1 = arith.constant 0 : i32
    return %c0_i32, %c0_i32_0 : i32, i32
  }
  func.func @transform_3(%arg0: i32) -> (i32, i32) {
    %c0_i32 = arith.constant 0 : i32
    %c0_i32_0 = arith.constant 0 : i32
    %c0_i32_1 = arith.constant 0 : i32
    return %c0_i32, %c0_i32_0 : i32, i32
  }
  func.func @transform_4(%arg0: i32) -> (i32, i32, i32, i32) {
    %c0_i32 = arith.constant 0 : i32
    %c0_i32_0 = arith.constant 0 : i32
    %c0_i32_1 = arith.constant 0 : i32
    %c0_i32_2 = arith.constant 0 : i32
    return %arg0, %c0_i32, %c0_i32_0, %c0_i32_1 : i32, i32, i32, i32
  }
}

</mosaic_0001>

<bundles_post_ra>
// kernel: tpu_custom_call.1
= control target key start
LH: loop header
LB: loop body
LE: loop exit
PB: predicated region body
PF: predicated region fallthrough
CT: control target
= control target key end

     0   :  { %9 = vsyncpa [#allocation4], 0  ;;  %s6626_s0 = inlined_call_operand.vmem [shape: f32[2,16,16,4], index: 0, kind: input, shape index: {}]   ;;  %s6627_s1 = inlined_call_operand.vmem [shape: f32[9,4,128], index: 1, kind: input, shape index: {}]   ;;  %s6628_s2 = inlined_call_operand.vmem [shape: f32[1,128], index: 2, kind: input, shape index: {}]   ;;  %s6629_s3 = inlined_call_operand.vmem [shape: f32[1,128], index: 3, kind: input, shape index: {}]   ;;  %s6630_s4 = inlined_call_operand.hbm [shape: f32[2,16,16,128], index: 4, kind: output, shape index: {}]  }
   0x1   :  { %11 = vsyncpa [#allocation4 + $0x1], 0  ;;  %s5443_s15 = smov 0   ;;  %s5445_s16 = smov 0  }
   0x2   :  { %s5447_s17 = smov 0   ;;  %s5449_s18 = smov 0  }
   0x3 LB: > { %s5464_s19 = sadd.s32 4294967295, %s5412_s18   ;;  %s3982_s20 = sadd.s32 4294967294, %s5412_s18   ;;  %s5412_s18 = sphi %s5449_s18, %s6744_s18   ;;  %s5408_s17 = sphi %s5447_s17, %s6743_s17   ;;  %s5404_s16 = sphi %s5445_s16, %s6742_s16   ;;  %s5400_s15 = sphi %s5443_s15, %s6741_s15  }
   0x4   : > { %s5468_s21 = sadd.s32 1, %s5412_s18   ;;  %s113_s22 = sadd.s32 1, %s5408_s17 }
   0x5   : > { %s110_s23 = ssub.s32 %s5412_s18, %s5468_s21  ;;  %p123_p0 = scmp.ne.s32.totalorder %s5408_s17, %s5404_s16 }
   0x6   : > { %p111_p1 = scmp.eq.s32.totalorder %s110_s23, 0  ;;  %p124_p2 = scmp.eq.s32.totalorder %s5464_s19, 1 }
   0x7   : > { %p129_p3 = scmp.ne.s32.totalorder %s5404_s16, %s5400_s15  ;;  %p130_p4 = scmp.eq.s32.totalorder %s3982_s20, 1 }
   0x8   : > { %s5479_s24 = scalar_select %p111_p1, %s5408_s17, %s113_s22  }
   0x9   : > { %p5481_p5 = por %p124_p2, %p123_p0  ;;  %p5485_p6 = por %p130_p4, %p129_p3 }
   0xa   : > { %p3985_p7 = scmp.ge.s32.totalorder %s5412_s18, 1  ;;  %p165_p8 = scmp.lt.s32.totalorder %s5412_s18, 3 }
   0xc   : > { %p166_p9 = pnand %p3985_p7, %p165_p8 }
   0xe   : > { %169 = sbr.rel (%p166_p9) target bundleno = 578 (0x242), region = 36 }
  0x15   : > { %v5494_v0 = vld [vmem:[%s6627_s1 + $0x4] sm:$0xf]  ;;  %vm480_vm0 = vcmask 1043456   ;;  %vm196_vm1 = vcmask 31744   ;;  %vm199_vm2 = vcmask 25600   ;;  %v5414_v1 = vmov 0.0  }
  0x16   : > { %4600 = vmatprep.subr.msk.mxu1 %vm480_vm0, %v5494_v0  ;;  %197 = vst.msk [vmem:[#allocation2] sm:$0xff] %vm196_vm1, %v5414_v1  ;;  %198 = vst.msk [vmem:[#allocation2 + $0x8] sm:$0xff] %vm196_vm1, %v5414_v1  ;;  %v5555_v2 = vld [vmem:[%s6627_s1 + $0x10] sm:$0xf]  ;;  %p191_p10 = scmp.lt.s32.totalorder %s5464_s19, 1  ;;  %s188_s7 = sand.u32 1, %s5404_s16  }
  0x17   : > { %201 = vst.msk [vmem:[#allocation2 + $0x18] sm:$0xff] %vm196_vm1, %v5414_v1  ;;  %202 = vst.msk [vmem:[#allocation2 + $0x20] sm:$0xff] %vm196_vm1, %v5414_v1  ;;  %v349_v3 = vld [vmem:[%s6627_s1] sm:$0xf]  ;;  %4601 = vmatpush3.msk.msra.mxu1 %vm480_vm0, %v5494_v0  ;;  %4800 = vmatprep.subr.msk.mxu0 %vm480_vm0, %v5555_v2  ;;  %v5568_v4 = vld [vmem:[%s6627_s1 + $0x14] sm:$0xf] }
  0x18   : > { %204 = vst.msk [vmem:[#allocation2 + $0x30] sm:$0xff] %vm196_vm1, %v5414_v1  ;;  %205 = vst.msk [vmem:[#allocation2 + $0x38] sm:$0xff] %vm196_vm1, %v5414_v1  ;;  %4801 = vmatpush3.msk.msra.mxu0 %vm480_vm0, %v5555_v2  ;;  %s192_s9 = scalar_select %p191_p10, %s5464_s19, 1  ;;  %4650 = vmatprep.subr.msk.mxu1 %vm480_vm0, %v349_v3  ;;  %v5587_v8 = vld [vmem:[%s6627_s1 + $0x8] sm:$0xf] }
  0x19   : > { %207 = vst.msk [vmem:[#allocation2 + $0x48] sm:$0xff] %vm196_vm1, %v5414_v1  ;;  %208 = vst.msk [vmem:[#allocation2 + $0x50] sm:$0xff] %vm196_vm1, %v5414_v1  ;;  %4850 = vmatprep.subr.msk.mxu0 %vm480_vm0, %v5568_v4  ;;  %v5642_v33 = vld [vmem:[%s6627_s1 + $0x18] sm:$0xf]  ;;  %v5771_v63 = vld [vmem:[%s6627_s1 + $0x1c] sm:$0xf] }
  0x1a   : > { %210 = vst.msk [vmem:[#allocation2 + $0x60] sm:$0xff] %vm196_vm1, %v5414_v1  ;;  %211 = vst.msk [vmem:[#allocation2 + $0x68] sm:$0xff] %vm196_vm1, %v5414_v1  ;;  %s4301_s10 = sshll.u32 %s192_s9, 8  ;;  %s3986_s12 = sshll.u32 %s188_s7, 8 }
  0x1b   : > { %213 = vst.msk [vmem:[#allocation2 + $0x78] sm:$0xff] %vm196_vm1, %v5414_v1  ;;  %214 = vst.msk [vmem:[#allocation2 + $0x80] sm:$0xff] %vm196_vm1, %v5414_v1  ;;  %s5579_s13 = scalar_lea.vmem %s6626_s0, %s4301_s10  ;;  %s4302_s14 = sshll.u32 %s5464_s19, 12 }
  0x1c   : > { %216 = vst.msk [vmem:[#allocation2 + $0x90] sm:$0xff] %vm196_vm1, %v5414_v1  ;;  %217 = vst.msk [vmem:[#allocation2 + $0x98] sm:$0xff] %vm196_vm1, %v5414_v1  ;;  %v252_v5 = vld [vmem:[%s5579_s13] sm:$0xff]  ;;  %v253_v6 = vld [vmem:[%s5579_s13 + $0x8] sm:$0xff]  ;;  %s6577_s27 = scalar_lea.hbm %s6630_s4, %s4302_s14  ;;  %s6585_s19 = scalar_lea.sflag [#allocation4], %s188_s7 }
  0x1d   : > { %219 = vst.msk [vmem:[#allocation2 + $0xa8] sm:$0xff] %vm196_vm1, %v5414_v1  ;;  %220 = vst.msk [vmem:[#allocation2 + $0xb0] sm:$0xff] %vm196_vm1, %v5414_v1  ;;  %v254_v7 = vld [vmem:[%s5579_s13 + $0x10] sm:$0xff]  ;;  %v350_v9 = vld [vmem:[#allocation2 + $0x1] sm:$0xff]  ;;  %s5415_s29 = smov [#allocation3]  }
  0x1e   : > { %222 = vst.msk [vmem:[#allocation2 + $0xc0] sm:$0xff] %vm196_vm1, %v5414_v1  ;;  %223 = vst.msk [vmem:[#allocation2 + $0xc8] sm:$0xff] %vm196_vm1, %v5414_v1  ;;  %v255_v11 = vld [vmem:[%s5579_s13 + $0x18] sm:$0xff]  ;;  %4602 = vmatprep.mubr.msk.f32.mxu1 %vm196_vm1, %v350_v9  ;;  %v256_v12 = vld [vmem:[%s5579_s13 + $0x20] sm:$0xff]  ;;  %s5354_s30 = sshll.u32 %s5415_s29, 4  ;;  %s5355_s30 = int_to_ptr.vmem [resolvable:$false] %s5354_s30 }
  0x1f   : > { %225 = vst.msk [vmem:[#allocation2 + $0xd8] sm:$0xff] %vm196_vm1, %v5414_v1  ;;  %226 = vst.msk [vmem:[#allocation2 + $0xe0] sm:$0xff] %vm196_vm1, %v5414_v1  ;;  %v257_v13 = vld [vmem:[%s5579_s13 + $0x28] sm:$0xff]  ;;  %v258_v14 = vld [vmem:[%s5579_s13 + $0x30] sm:$0xff]  ;;  %s5356_s5 = scalar_lea.vmem %s5355_s30, 8192 }
  0x20   : > { %228 = vst.msk [vmem:[#allocation2 + $0xf0] sm:$0xff] %vm196_vm1, %v5414_v1  ;;  %229 = vst.msk [vmem:[#allocation2 + $0xf8] sm:$0xff] %vm196_vm1, %v5414_v1  ;;  %v259_v15 = vld [vmem:[%s5579_s13 + $0x38] sm:$0xff]  ;;  %v260_v16 = vld [vmem:[%s5579_s13 + $0x40] sm:$0xff] }
  0x21   : > { %231 = vst.msk [vmem:[#allocation2 + $0x108] sm:$0xff] %vm196_vm1, %v5414_v1  ;;  %232 = vst.msk [vmem:[#allocation2 + $0x110] sm:$0xff] %vm196_vm1, %v5414_v1  ;;  %v261_v17 = vld [vmem:[%s5579_s13 + $0x48] sm:$0xff]  ;;  %v262_v18 = vld [vmem:[%s5579_s13 + $0x50] sm:$0xff] }
  0x22   : > { %234 = vst.msk [vmem:[#allocation2 + $0x120] sm:$0xff] %vm196_vm1, %v5414_v1  ;;  %235 = vst.msk [vmem:[#allocation2 + $0x128] sm:$0xff] %vm196_vm1, %v5414_v1  ;;  %v263_v19 = vld [vmem:[%s5579_s13 + $0x58] sm:$0xff]  ;;  %v264_v20 = vld [vmem:[%s5579_s13 + $0x60] sm:$0xff] }
  0x23   : > { %237 = vst.msk [vmem:[#allocation2 + $0x138] sm:$0xff] %vm196_vm1, %v5414_v1  ;;  %238 = vst.msk [vmem:[#allocation2 + $0x140] sm:$0xff] %vm196_vm1, %v5414_v1  ;;  %v265_v21 = vld [vmem:[%s5579_s13 + $0x68] sm:$0xff]  ;;  %v266_v22 = vld [vmem:[%s5579_s13 + $0x70] sm:$0xff] }
  0x24   : > { %240 = vst.msk [vmem:[#allocation2 + $0x150] sm:$0xff] %vm196_vm1, %v5414_v1  ;;  %241 = vst.msk [vmem:[#allocation2 + $0x158] sm:$0xff] %vm196_vm1, %v5414_v1  ;;  %v267_v23 = vld [vmem:[%s5579_s13 + $0x78] sm:$0xff]  ;;  %v268_v24 = vld [vmem:[%s5579_s13 + $0x80] sm:$0xff] }
  0x25   : > { %243 = vst.msk [vmem:[#allocation2 + $0x168] sm:$0xff] %vm196_vm1, %v5414_v1  ;;  %244 = vst.msk [vmem:[#allocation2 + $0x170] sm:$0xff] %vm196_vm1, %v5414_v1  ;;  %v269_v25 = vld [vmem:[%s5579_s13 + $0x88] sm:$0xff]  ;;  %v270_v26 = vld [vmem:[%s5579_s13 + $0x90] sm:$0xff] }
  0x26   : > { %246 = vst.msk [vmem:[#allocation2 + $0x180] sm:$0xff] %vm196_vm1, %v5414_v1  ;;  %247 = vst.msk [vmem:[#allocation2 + $0x188] sm:$0xff] %vm196_vm1, %v5414_v1  ;;  %v271_v27 = vld [vmem:[%s5579_s13 + $0x98] sm:$0xff]  ;;  %v272_v28 = vld [vmem:[%s5579_s13 + $0xa0] sm:$0xff] }
  0x27   : > { %249 = vst.msk [vmem:[#allocation2 + $0x198] sm:$0xff] %vm196_vm1, %v5414_v1  ;;  %250 = vst.msk [vmem:[#allocation2 + $0x1a0] sm:$0xff] %vm196_vm1, %v5414_v1  ;;  %v273_v29 = vld [vmem:[%s5579_s13 + $0xa8] sm:$0xff]  ;;  %v274_v38 = vld [vmem:[%s5579_s13 + $0xb0] sm:$0xff] }
  0x28   : > { %200 = vst.msk [vmem:[#allocation2 + $0x10] sm:$0x3] %vm199_vm2, %v5414_v1  ;;  %203 = vst.msk [vmem:[#allocation2 + $0x28] sm:$0x3] %vm199_vm2, %v5414_v1  ;;  %v275_v39 = vld [vmem:[%s5579_s13 + $0xb8] sm:$0xff]  ;;  %v276_v40 = vld [vmem:[%s5579_s13 + $0xc0] sm:$0xff] }
  0x29   : > { %206 = vst.msk [vmem:[#allocation2 + $0x40] sm:$0x3] %vm199_vm2, %v5414_v1  ;;  %209 = vst.msk [vmem:[#allocation2 + $0x58] sm:$0x3] %vm199_vm2, %v5414_v1  ;;  %v277_v42 = vld [vmem:[%s5579_s13 + $0xc8] sm:$0xff]  ;;  %v278_v44 = vld [vmem:[%s5579_s13 + $0xd0] sm:$0xff] }
  0x2a   : > { %212 = vst.msk [vmem:[#allocation2 + $0x70] sm:$0x3] %vm199_vm2, %v5414_v1  ;;  %215 = vst.msk [vmem:[#allocation2 + $0x88] sm:$0x3] %vm199_vm2, %v5414_v1  ;;  %v279_v45 = vld [vmem:[%s5579_s13 + $0xd8] sm:$0xff]  ;;  %v280_v46 = vld [vmem:[%s5579_s13 + $0xe0] sm:$0xff] }
  0x2b   : > { %218 = vst.msk [vmem:[#allocation2 + $0xa0] sm:$0x3] %vm199_vm2, %v5414_v1  ;;  %221 = vst.msk [vmem:[#allocation2 + $0xb8] sm:$0x3] %vm199_vm2, %v5414_v1  ;;  %v281_v47 = vld [vmem:[%s5579_s13 + $0xe8] sm:$0xff]  ;;  %v282_v57 = vld [vmem:[%s5579_s13 + $0xf0] sm:$0xff] }
  0x2c   : > { %224 = vst.msk [vmem:[#allocation2 + $0xd0] sm:$0x3] %vm199_vm2, %v5414_v1  ;;  %227 = vst.msk [vmem:[#allocation2 + $0xe8] sm:$0x3] %vm199_vm2, %v5414_v1  ;;  %v283_v58 = vld [vmem:[%s5579_s13 + $0xf8] sm:$0xff]  ;;  %s6476_s13 = scalar_lea.vmem [#allocation3], %s3986_s12 }
  0x2d   : > { %230 = vst.msk [vmem:[#allocation2 + $0x100] sm:$0x3] %vm199_vm2, %v5414_v1  ;;  %233 = vst.msk [vmem:[#allocation2 + $0x118] sm:$0x3] %vm199_vm2, %v5414_v1  ;;  %s3920_s20 = sshll.u32 %s6476_s13, 4  ;;  %s6579_s20 = int_to_ptr.vmem [resolvable:$true] %s3920_s20 }
  0x2e   : > { %236 = vst.msk [vmem:[#allocation2 + $0x130] sm:$0x3] %vm199_vm2, %v5414_v1  ;;  %239 = vst.msk [vmem:[#allocation2 + $0x148] sm:$0x3] %vm199_vm2, %v5414_v1  ;;  %s5350_s28 = scalar_lea.vmem %s6579_s20, 4096  ;;  %p5357_p0 = scmp.lt.s32.totalorder %s6579_s20, %s5355_s30 }
  0x2f   : > { %242 = vst.msk [vmem:[#allocation2 + $0x160] sm:$0x3] %vm199_vm2, %v5414_v1  ;;  %245 = vst.msk [vmem:[#allocation2 + $0x178] sm:$0x3] %vm199_vm2, %v5414_v1  ;;  %v351_v10 = vld [vmem:[#allocation2 + $0x9] sm:$0xff]  ;;  %p5351_p11 = scmp.ne.s32.totalorder %s6579_s20, %s5350_s28  ;;  %p5358_p1 = scmp.lt.s32.totalorder %s5356_s5, %s5350_s28 }
  0x30   : > { %248 = vst.msk [vmem:[#allocation2 + $0x190] sm:$0x3] %vm199_vm2, %v5414_v1  ;;  %251 = vst.msk [vmem:[#allocation2 + $0x1a8] sm:$0x3] %vm199_vm2, %v5414_v1  ;;  %4603 = vmatmul.mubr.msk.f32.vlgmr.msra.gmra.mrb[0].mxu1 %vm196_vm1, %v351_v10 }
  0x31   : > { %285 = vst.msk [vmem:[#allocation2 + $0x19] sm:$0xff] %vm196_vm1, %v252_v5  ;;  %286 = vst.msk [vmem:[#allocation2 + $0x21] sm:$0xff] %vm196_vm1, %v253_v6  ;;  %4651 = vmatpush3.msk.msra.mxu1 %vm480_vm0, %v349_v3  ;;  %p5352_p12 = pnand %p5351_p11, %p5481_p5  ;;  %p5359_p2 = por %p5358_p1, %p5357_p0 }
  0x32   : > { %287 = vst.msk [vmem:[#allocation2 + $0x31] sm:$0xff] %vm196_vm1, %v254_v7  ;;  %288 = vst.msk [vmem:[#allocation2 + $0x39] sm:$0xff] %vm196_vm1, %v255_v11  ;;  %4700 = vmatprep.subr.msk.mxu1 %vm480_vm0, %v5587_v8 }
  0x33   : > { %289 = vst.msk [vmem:[#allocation2 + $0x49] sm:$0xff] %vm196_vm1, %v256_v12  ;;  %290 = vst.msk [vmem:[#allocation2 + $0x51] sm:$0xff] %vm196_vm1, %v257_v13  ;;  %p5353_p13 = pneg %p5352_p12 }
  0x34   : > { %291 = vst.msk [vmem:[#allocation2 + $0x61] sm:$0xff] %vm196_vm1, %v258_v14  ;;  %292 = vst.msk [vmem:[#allocation2 + $0x69] sm:$0xff] %vm196_vm1, %v259_v15 }
  0x35   : > { %293 = vst.msk [vmem:[#allocation2 + $0x79] sm:$0xff] %vm196_vm1, %v260_v16  ;;  %294 = vst.msk [vmem:[#allocation2 + $0x81] sm:$0xff] %vm196_vm1, %v261_v17  ;;  %p5360_p3 = pnand %p5359_p2, %p5353_p13 }
  0x36   : > { %295 = vst.msk [vmem:[#allocation2 + $0x91] sm:$0xff] %vm196_vm1, %v262_v18  ;;  %296 = vst.msk [vmem:[#allocation2 + $0x99] sm:$0xff] %vm196_vm1, %v263_v19 }
  0x37   : > { %297 = vst.msk [vmem:[#allocation2 + $0xa9] sm:$0xff] %vm196_vm1, %v264_v20  ;;  %298 = vst.msk [vmem:[#allocation2 + $0xb1] sm:$0xff] %vm196_vm1, %v265_v21 }
  0x38   : > { %299 = vst.msk [vmem:[#allocation2 + $0xc1] sm:$0xff] %vm196_vm1, %v266_v22  ;;  %300 = vst.msk [vmem:[#allocation2 + $0xc9] sm:$0xff] %vm196_vm1, %v267_v23  ;;  %v352_v30 = vld [vmem:[#allocation2 + $0x19] sm:$0xff]  ;;  %v353_v31 = vld [vmem:[#allocation2 + $0x21] sm:$0xff] }
  0x39   : > { %301 = vst.msk [vmem:[#allocation2 + $0xd9] sm:$0xff] %vm196_vm1, %v268_v24  ;;  %302 = vst.msk [vmem:[#allocation2 + $0xe1] sm:$0xff] %vm196_vm1, %v269_v25  ;;  %v5632_v32 = vld [vmem:[#allocation2 + $0x31] sm:$0xff]  ;;  %4605 = vmatprep.mubr.msk.f32.mxu1 %vm196_vm1, %v352_v30  ;;  %4802 = vmatprep.mubr.msk.f32.mxu0 %vm196_vm1, %v352_v30  ;;  %v5650_v34 = vld [vmem:[#allocation2 + $0x39] sm:$0xff] }
  0x3a   : > { %303 = vst.msk [vmem:[#allocation2 + $0xf1] sm:$0xff] %vm196_vm1, %v270_v26  ;;  %304 = vst.msk [vmem:[#allocation2 + $0xf9] sm:$0xff] %vm196_vm1, %v271_v27  ;;  %4606 = vmatmul.mubr.msk.f32.gmra.mrb[2].mxu1 %vm196_vm1, %v353_v31  ;;  %4803 = vmatmul.mubr.msk.f32.vlgmr.msra.gmra.mrb[0].mxu0 %vm196_vm1, %v353_v31  ;;  %v5654_v35 = vld [vmem:[#allocation2 + $0x49] sm:$0xff]  ;;  %v5666_v36 = vld [vmem:[#allocation2 + $0x51] sm:$0xff] }
  0x3b   : > { %305 = vst.msk [vmem:[#allocation2 + $0x109] sm:$0xff] %vm196_vm1, %v272_v28  ;;  %306 = vst.msk [vmem:[#allocation2 + $0x111] sm:$0xff] %vm196_vm1, %v273_v29  ;;  %4851 = vmatpush3.msk.msra.mxu0 %vm480_vm0, %v5568_v4  ;;  %4608 = vmatprep.mubr.msk.f32.mxu1 %vm196_vm1, %v5632_v32  ;;  %v5668_v37 = vld [vmem:[#allocation2 + $0x61] sm:$0xff]  ;;  %v5682_v41 = vld [vmem:[#allocation2 + $0x69] sm:$0xff] }
  0x3c   : > { %4805 = vmatprep.mubr.msk.f32.mxu0 %vm196_vm1, %v5632_v32  ;;  %4900 = vmatprep.subr.msk.mxu0 %vm480_vm0, %v5642_v33  ;;  %307 = vst.msk [vmem:[#allocation2 + $0x121] sm:$0xff] %vm196_vm1, %v274_v38  ;;  %308 = vst.msk [vmem:[#allocation2 + $0x129] sm:$0xff] %vm196_vm1, %v275_v39  ;;  %v5687_v43 = vld [vmem:[#allocation2 + $0x79] sm:$0xff]  ;;  %v5705_v48 = vld [vmem:[#allocation2 + $0x81] sm:$0xff] }
  0x3d   : > { %309 = vst.msk [vmem:[#allocation2 + $0x139] sm:$0xff] %vm196_vm1, %v276_v40  ;;  %310 = vst.msk [vmem:[#allocation2 + $0x141] sm:$0xff] %vm196_vm1, %v277_v42  ;;  %v5708_v49 = vld [vmem:[#allocation2 + $0x91] sm:$0xff]  ;;  %v5718_v50 = vld [vmem:[#allocation2 + $0x99] sm:$0xff] }
  0x3e   : > { %4609 = vmatmul.mubr.msk.f32.gmra.mrb[4].mxu1 %vm196_vm1, %v5650_v34  ;;  %4806 = vmatmul.mubr.msk.f32.gmra.mrb[2].mxu0 %vm196_vm1, %v5650_v34  ;;  %311 = vst.msk [vmem:[#allocation2 + $0x151] sm:$0xff] %vm196_vm1, %v278_v44  ;;  %312 = vst.msk [vmem:[#allocation2 + $0x159] sm:$0xff] %vm196_vm1, %v279_v45  ;;  %v5720_v51 = vld [vmem:[#allocation2 + $0xa9] sm:$0xff]  ;;  %v5730_v52 = vld [vmem:[#allocation2 + $0xb1] sm:$0xff] }
  0x3f   : > { %4611 = vmatprep.mubr.msk.f32.mxu1 %vm196_vm1, %v5654_v35  ;;  %4808 = vmatprep.mubr.msk.f32.mxu0 %vm196_vm1, %v5654_v35  ;;  %313 = vst.msk [vmem:[#allocation2 + $0x169] sm:$0xff] %vm196_vm1, %v280_v46  ;;  %314 = vst.msk [vmem:[#allocation2 + $0x171] sm:$0xff] %vm196_vm1, %v281_v47  ;;  %v5732_v53 = vld [vmem:[#allocation2 + $0xc1] sm:$0xff]  ;;  %v5742_v54 = vld [vmem:[#allocation2 + $0xc9] sm:$0xff] }
  0x40   : > { %6679 = vst [vmem:[#allocation6_spill] sm:$0xff] %v5742_v54  ;;  %v5744_v55 = vld [vmem:[#allocation2 + $0x1a] sm:$0xff]  ;;  %315 = vst.msk [vmem:[#allocation2 + $0x181] sm:$0xff] %vm196_vm1, %v282_v57  ;;  %v5762_v60 = vld [vmem:[#allocation2 + $0x22] sm:$0xff] }
  0x41   : > { %v5746_v56 = vld [vmem:[#allocation2 + $0xd9] sm:$0xff]  ;;  %316 = vst.msk [vmem:[#allocation2 + $0x189] sm:$0xff] %vm196_vm1, %v283_v58  ;;  %v5760_v59 = vld [vmem:[#allocation2 + $0xe1] sm:$0xff]  ;;  %v5764_v61 = vld [vmem:[#allocation2 + $0xf1] sm:$0xff] }
  0x42   : > { %4612 = vmatmul.mubr.msk.f32.gmra.mrb[6].mxu1 %vm196_vm1, %v5666_v36  ;;  %4809 = vmatmul.mubr.msk.f32.gmra.mrb[4].mxu0 %vm196_vm1, %v5666_v36  ;;  %6680 = vst [vmem:[#allocation7_spill] sm:$0xff] %v5746_v56  ;;  %6681 = vst [vmem:[#allocation8_spill] sm:$0xff] %v5760_v59  ;;  %v5766_v62 = vld [vmem:[#allocation2 + $0x32] sm:$0xff]  ;;  %v5783_v1 = vld [vmem:[#allocation2 + $0x3a] sm:$0xff] }
  0x43   : > { %4614 = vmatprep.mubr.msk.f32.mxu1 %vm196_vm1, %v5668_v37  ;;  %4811 = vmatprep.mubr.msk.f32.mxu0 %vm196_vm1, %v5668_v37  ;;  %6682 = vst [vmem:[#allocation9_spill] sm:$0xff] %v5764_v61  ;;  %v5781_v0 = vld [vmem:[#allocation2 + $0xf9] sm:$0xff]  ;;  %v5787_v3 = vld [vmem:[#allocation2 + $0x109] sm:$0xff]  ;;  %v5801_v5 = vld [vmem:[#allocation2 + $0x111] sm:$0xff] }
  0x44   : > { %6683 = vst [vmem:[#allocation10_spill] sm:$0xff] %v5781_v0  ;;  %6684 = vst [vmem:[#allocation11_spill] sm:$0xff] %v5787_v3  ;;  %v5789_v4 = vld [vmem:[#allocation2 + $0x4a] sm:$0xff]  ;;  %v5803_v6 = vld [vmem:[#allocation2 + $0x52] sm:$0xff] }
  0x45   : > { %6685 = vst [vmem:[#allocation12_spill] sm:$0xff] %v5801_v5  ;;  %v5805_v7 = vld [vmem:[#allocation2 + $0x121] sm:$0xff]  ;;  %v5817_v10 = vld [vmem:[#allocation2 + $0x129] sm:$0xff]  ;;  %v5821_v12 = vld [vmem:[#allocation2 + $0x139] sm:$0xff] }
  0x46   : > { %4615 = vmatmul.mubr.msk.f32.gmra.mrb[8].mxu1 %vm196_vm1, %v5682_v41  ;;  %4812 = vmatmul.mubr.msk.f32.gmra.mrb[6].mxu0 %vm196_vm1, %v5682_v41  ;;  %6686 = vst [vmem:[#allocation13_spill] sm:$0xff] %v5805_v7  ;;  %v5807_v9 = vld [vmem:[#allocation2 + $0x62] sm:$0xff]  ;;  %6687 = vst [vmem:[#allocation14_spill] sm:$0xff] %v5817_v10  ;;  %v5819_v11 = vld [vmem:[#allocation2 + $0x6a] sm:$0xff] }
  0x47   : > { %4617 = vmatprep.mubr.msk.f32.mxu1 %vm196_vm1, %v5687_v43  ;;  %4814 = vmatprep.mubr.msk.f32.mxu0 %vm196_vm1, %v5687_v43  ;;  %6688 = vst [vmem:[#allocation15_spill] sm:$0xff] %v5821_v12  ;;  %v5823_v13 = vld [vmem:[#allocation2 + $0x7a] sm:$0xff]  ;;  %v5835_v15 = vld [vmem:[#allocation2 + $0x82] sm:$0xff]  ;;  %v5837_v16 = vld [vmem:[#allocation2 + $0x151] sm:$0xff] }
  0x48   : > { %v5833_v14 = vld [vmem:[#allocation2 + $0x141] sm:$0xff]  ;;  %6690 = vst [vmem:[#allocation17_spill] sm:$0xff] %v5837_v16  ;;  %v5839_v17 = vld [vmem:[#allocation2 + $0x92] sm:$0xff]  ;;  %v5853_v20 = vld [vmem:[#allocation2 + $0x169] sm:$0xff] }
  0x49   : > { %6689 = vst [vmem:[#allocation16_spill] sm:$0xff] %v5833_v14  ;;  %v5849_v18 = vld [vmem:[#allocation2 + $0x159] sm:$0xff]  ;;  %6692 = vst [vmem:[#allocation19_spill] sm:$0xff] %v5853_v20  ;;  %v5855_v21 = vld [vmem:[#allocation2 + $0xaa] sm:$0xff] }
  0x4a   : > { %4618 = vmatmul.mubr.msk.f32.gmra.mrb[10].mxu1 %vm196_vm1, %v5705_v48  ;;  %4815 = vmatmul.mubr.msk.f32.gmra.mrb[8].mxu0 %vm196_vm1, %v5705_v48  ;;  %6691 = vst [vmem:[#allocation18_spill] sm:$0xff] %v5849_v18  ;;  %v5851_v19 = vld [vmem:[#allocation2 + $0x9a] sm:$0xff]  ;;  %v5865_v22 = vld [vmem:[#allocation2 + $0x171] sm:$0xff]  ;;  %v5869_v25 = vld [vmem:[#allocation2 + $0xc2] sm:$0xff] }
  0x4b   : > { %4620 = vmatprep.mubr.msk.f32.mxu1 %vm196_vm1, %v5708_v49  ;;  %4817 = vmatprep.mubr.msk.f32.mxu0 %vm196_vm1, %v5708_v49  ;;  %6693 = vst [vmem:[#allocation20_spill] sm:$0xff] %v5865_v22  ;;  %v5867_v23 = vld [vmem:[#allocation2 + $0xb2] sm:$0xff]  ;;  %v317_v24 = vld [vmem:[#allocation2] sm:$0xff]  ;;  %v318_v26 = vld [vmem:[#allocation2 + $0x8] sm:$0xff] }
  0x4c   : > { %v5878_v27 = vld [vmem:[#allocation2 + $0xca] sm:$0xff]  ;;  %v5880_v28 = vld [vmem:[#allocation2 + $0x18] sm:$0xff]  ;;  %v5896_v31 = vld [vmem:[#allocation2 + $0x20] sm:$0xff] }
  0x4d   : > { %6694 = vst [vmem:[#allocation21_spill] sm:$0xff] %v5880_v28  ;;  %v5882_v29 = vld [vmem:[#allocation2 + $0xda] sm:$0xff]  ;;  %v5890_v30 = vld [vmem:[%s6627_s1 + $0xc] sm:$0xf]  ;;  %6695 = vst [vmem:[#allocation22_spill] sm:$0xff] %v5896_v31 }
  0x4e   : > { %4621 = vmatmul.mubr.msk.f32.gmra.mrb[12].mxu1 %vm196_vm1, %v5718_v50  ;;  %4818 = vmatmul.mubr.msk.f32.gmra.mrb[10].mxu0 %vm196_vm1, %v5718_v50  ;;  %v5902_v38 = vld [vmem:[#allocation2 + $0x30] sm:$0xff]  ;;  %v5918_v40 = vld [vmem:[#allocation2 + $0xfa] sm:$0xff]  ;;  %v5920_v42 = vld [vmem:[#allocation2 + $0x48] sm:$0xff] }
  0x4f   : > { %4623 = vmatprep.mubr.msk.f32.mxu1 %vm196_vm1, %v5720_v51  ;;  %4820 = vmatprep.mubr.msk.f32.mxu0 %vm196_vm1, %v5720_v51  ;;  %6696 = vst [vmem:[#allocation23_spill] sm:$0xff] %v5902_v38  ;;  %v5904_v39 = vld [vmem:[#allocation2 + $0xf2] sm:$0xff]  ;;  %6698 = vst [vmem:[#allocation25_spill] sm:$0xff] %v5920_v42  ;;  %v5922_v44 = vld [vmem:[#allocation2 + $0x10a] sm:$0xff] }
  0x50   : > { %v5932_v45 = vld [vmem:[#allocation2 + $0x50] sm:$0xff]  ;;  %v5936_v47 = vld [vmem:[#allocation2 + $0x60] sm:$0xff]  ;;  %v5948_v58 = vld [vmem:[#allocation2 + $0x68] sm:$0xff] }
  0x51   : > { %6699 = vst [vmem:[#allocation26_spill] sm:$0xff] %v5932_v45  ;;  %v5934_v46 = vld [vmem:[#allocation2 + $0x112] sm:$0xff]  ;;  %6700 = vst [vmem:[#allocation27_spill] sm:$0xff] %v5936_v47  ;;  %v5938_v57 = vld [vmem:[#allocation2 + $0x122] sm:$0xff] }
  0x52   : > { %4624 = vmatmul.mubr.msk.f32.gmra.mrb[14].mxu1 %vm196_vm1, %v5730_v52  ;;  %4821 = vmatmul.mubr.msk.f32.gmra.mrb[12].mxu0 %vm196_vm1, %v5730_v52  ;;  %6701 = vst [vmem:[#allocation28_spill] sm:$0xff] %v5948_v58 }
  0x53   : > { %4626 = vmatprep.mubr.msk.f32.mxu1 %vm196_vm1, %v5732_v53  ;;  %4823 = vmatprep.mubr.msk.f32.mxu0 %vm196_vm1, %v5732_v53 }
  0x56   : > { %4627 = vmatmul.mubr.msk.f32.gmra.mrb[16].mxu1 %vm196_vm1, %v5742_v54  ;;  %4824 = vmatmul.mubr.msk.f32.gmra.mrb[14].mxu0 %vm196_vm1, %v5742_v54  ;;  %v6026_v54 = vld [vmem:[#allocation2 + $0xe0] sm:$0xff] }
  0x57   : > { %4629 = vmatprep.mubr.msk.f32.mxu1 %vm196_vm1, %v5746_v56  ;;  %4852 = vmatprep.mubr.msk.f32.mxu0 %vm196_vm1, %v5744_v55  ;;  %v6014_v56 = vld [vmem:[#allocation2 + $0x18a] sm:$0xff] }
  0x58   : > { %6709 = vst [vmem:[#allocation36_spill] sm:$0xff] %v6014_v56 }
  0x5a   : > { %4630 = vmatmul.mubr.msk.f32.gmra.mrb[18].mxu1 %vm196_vm1, %v5760_v59  ;;  %4853 = vmatmul.mubr.msk.f32.vlgmr.msra.gmra.mrb[0].mxu0 %vm196_vm1, %v5762_v60  ;;  %v6002_v59 = vld [vmem:[#allocation2 + $0x182] sm:$0xff] }
  0x5b   : > { %4901 = vmatpush3.msk.msra.mxu0 %vm480_vm0, %v5642_v33  ;;  %4632 = vmatprep.mubr.msk.f32.mxu1 %vm196_vm1, %v5764_v61  ;;  %v5898_v33 = vld [vmem:[#allocation2 + $0xe2] sm:$0xff]  ;;  %6708 = vst [vmem:[#allocation35_spill] sm:$0xff] %v6002_v59 }
  0x5c   : > { %4855 = vmatprep.mubr.msk.f32.mxu0 %vm196_vm1, %v5766_v62  ;;  %4950 = vmatprep.subr.msk.mxu0 %vm480_vm0, %v5771_v63  ;;  %v6000_v61 = vld [vmem:[#allocation2 + $0xc0] sm:$0xff] }
  0x5e   : > { %4633 = vmatmul.mubr.msk.f32.gmra.mrb[20].mxu1 %vm196_vm1, %v5781_v0  ;;  %4856 = vmatmul.mubr.msk.f32.gmra.mrb[2].mxu0 %vm196_vm1, %v5783_v1  ;;  %v5998_v0 = vld [vmem:[#allocation2 + $0x172] sm:$0xff] }
  0x5f   : > { %4635 = vmatprep.mubr.msk.f32.mxu1 %vm196_vm1, %v5787_v3  ;;  %4858 = vmatprep.mubr.msk.f32.mxu0 %vm196_vm1, %v5789_v4  ;;  %v5996_v3 = vld [vmem:[#allocation2 + $0xb0] sm:$0xff]  ;;  %6707 = vst [vmem:[#allocation34_spill] sm:$0xff] %v5998_v0 }
  0x60   : > { %6706 = vst [vmem:[#allocation33_spill] sm:$0xff] %v5996_v3 }
  0x62   : > { %4636 = vmatmul.mubr.msk.f32.gmra.mrb[22].mxu1 %vm196_vm1, %v5801_v5  ;;  %4859 = vmatmul.mubr.msk.f32.gmra.mrb[4].mxu0 %vm196_vm1, %v5803_v6  ;;  %v5986_v5 = vld [vmem:[#allocation2 + $0x16a] sm:$0xff] }
  0x63   : > { %4638 = vmatprep.mubr.msk.f32.mxu1 %vm196_vm1, %v5805_v7  ;;  %4861 = vmatprep.mubr.msk.f32.mxu0 %vm196_vm1, %v5807_v9  ;;  %v5984_v7 = vld [vmem:[#allocation2 + $0xa8] sm:$0xff] }
  0x66   : > { %4639 = vmatmul.mubr.msk.f32.gmra.mrb[24].mxu1 %vm196_vm1, %v5817_v10  ;;  %4862 = vmatmul.mubr.msk.f32.gmra.mrb[6].mxu0 %vm196_vm1, %v5819_v11  ;;  %v5982_v10 = vld [vmem:[#allocation2 + $0x15a] sm:$0xff] }
  0x67   : > { %4641 = vmatprep.mubr.msk.f32.mxu1 %vm196_vm1, %v5821_v12  ;;  %4864 = vmatprep.mubr.msk.f32.mxu0 %vm196_vm1, %v5823_v13  ;;  %v5980_v12 = vld [vmem:[#allocation2 + $0x98] sm:$0xff] }
  0x68   : > { %6705 = vst [vmem:[#allocation32_spill] sm:$0xff] %v5980_v12 }
  0x6a   : > { %4642 = vmatmul.mubr.msk.f32.gmra.mrb[26].mxu1 %vm196_vm1, %v5833_v14  ;;  %4865 = vmatmul.mubr.msk.f32.gmra.mrb[8].mxu0 %vm196_vm1, %v5835_v15  ;;  %v5970_v14 = vld [vmem:[#allocation2 + $0x152] sm:$0xff] }
  0x6b   : > { %4644 = vmatprep.mubr.msk.f32.mxu1 %vm196_vm1, %v5837_v16  ;;  %4867 = vmatprep.mubr.msk.f32.mxu0 %vm196_vm1, %v5839_v17  ;;  %v5968_v16 = vld [vmem:[#allocation2 + $0x90] sm:$0xff] }
  0x6c   : > { %6704 = vst [vmem:[#allocation31_spill] sm:$0xff] %v5968_v16 }
  0x6e   : > { %4645 = vmatmul.mubr.msk.f32.gmra.mrb[28].mxu1 %vm196_vm1, %v5849_v18  ;;  %4868 = vmatmul.mubr.msk.f32.gmra.mrb[10].mxu0 %vm196_vm1, %v5851_v19  ;;  %v5966_v18 = vld [vmem:[#allocation2 + $0x142] sm:$0xff] }
  0x6f   : > { %4647 = vmatprep.mubr.msk.f32.mxu1 %vm196_vm1, %v5853_v20  ;;  %4870 = vmatprep.mubr.msk.f32.mxu0 %vm196_vm1, %v5855_v21  ;;  %v5964_v20 = vld [vmem:[#allocation2 + $0x80] sm:$0xff] }
  0x70   : > { %6703 = vst [vmem:[#allocation30_spill] sm:$0xff] %v5964_v20 }
  0x72   : > { %4648 = vmatmul.mubr.msk.f32.gmra.mrb[30].mxu1 %vm196_vm1, %v5865_v22  ;;  %4871 = vmatmul.mubr.msk.f32.gmra.mrb[12].mxu0 %vm196_vm1, %v5867_v23  ;;  %v5954_v22 = vld [vmem:[#allocation2 + $0x13a] sm:$0xff] }
  0x73   : > { %4652 = vmatprep.mubr.msk.f32.mxu1 %vm196_vm1, %v317_v24  ;;  %4873 = vmatprep.mubr.msk.f32.mxu0 %vm196_vm1, %v5869_v25  ;;  %v5950_v24 = vld [vmem:[#allocation2 + $0x12a] sm:$0xff] }
  0x76   : > { %4653 = vmatmul.mubr.msk.f32.vlgmr.msra.gmra.mrb[0].mxu1 %vm196_vm1, %v318_v26  ;;  %4874 = vmatmul.mubr.msk.f32.gmra.mrb[14].mxu0 %vm196_vm1, %v5878_v27  ;;  %v5952_v26 = vld [vmem:[#allocation2 + $0x78] sm:$0xff] }
  0x77   : > { %4655 = vmatprep.mubr.msk.f32.mxu1 %vm196_vm1, %v5880_v28  ;;  %4876 = vmatprep.mubr.msk.f32.mxu0 %vm196_vm1, %v5882_v29  ;;  %6702 = vst [vmem:[#allocation29_spill] sm:$0xff] %v5952_v26  ;;  %v6016_v28 = vld [vmem:[#allocation2 + $0xd8] sm:$0xff] }
  0x78   : > { %4701 = vmatpush3.msk.msra.mxu1 %vm480_vm0, %v5587_v8  ;;  %v5916_v8 = vld [vmem:[#allocation2 + $0x38] sm:$0xff] }
  0x79   : > { %4750 = vmatprep.subr.msk.mxu1 %vm480_vm0, %v5890_v30  ;;  %6697 = vst [vmem:[#allocation24_spill] sm:$0xff] %v5916_v8 }
  0x7a   : > { %4656 = vmatmul.mubr.msk.f32.gmra.mrb[2].mxu1 %vm196_vm1, %v5896_v31  ;;  %4877 = vmatmul.mubr.msk.f32.gmra.mrb[16].mxu0 %vm196_vm1, %v5898_v33  ;;  %v6012_v31 = vld [vmem:[#allocation2 + $0xc8] sm:$0xff] }
  0x7b   : > { %4658 = vmatprep.mubr.msk.f32.mxu1 %vm196_vm1, %v5902_v38  ;;  %4879 = vmatprep.mubr.msk.f32.mxu0 %vm196_vm1, %v5904_v39 }
  0x7e   : > { %4659 = vmatmul.mubr.msk.f32.gmra.mrb[4].mxu1 %vm196_vm1, %v5916_v8  ;;  %4880 = vmatmul.mubr.msk.f32.gmra.mrb[18].mxu0 %vm196_vm1, %v5918_v40 }
  0x7f   : > { %4661 = vmatprep.mubr.msk.f32.mxu1 %vm196_vm1, %v5920_v42  ;;  %4882 = vmatprep.mubr.msk.f32.mxu0 %vm196_vm1, %v5922_v44 }
  0x82   : > { %4662 = vmatmul.mubr.msk.f32.gmra.mrb[6].mxu1 %vm196_vm1, %v5932_v45  ;;  %4883 = vmatmul.mubr.msk.f32.gmra.mrb[20].mxu0 %vm196_vm1, %v5934_v46 }
  0x83   : > { %4664 = vmatprep.mubr.msk.f32.mxu1 %vm196_vm1, %v5936_v47  ;;  %4885 = vmatprep.mubr.msk.f32.mxu0 %vm196_vm1, %v5938_v57 }
  0x86   : > { %4665 = vmatmul.mubr.msk.f32.gmra.mrb[8].mxu1 %vm196_vm1, %v5948_v58  ;;  %4886 = vmatmul.mubr.msk.f32.gmra.mrb[22].mxu0 %vm196_vm1, %v5950_v24 }
  0x87   : > { %4667 = vmatprep.mubr.msk.f32.mxu1 %vm196_vm1, %v5952_v26  ;;  %4888 = vmatprep.mubr.msk.f32.mxu0 %vm196_vm1, %v5954_v22 }
  0x8a   : > { %4668 = vmatmul.mubr.msk.f32.gmra.mrb[10].mxu1 %vm196_vm1, %v5964_v20  ;;  %4889 = vmatmul.mubr.msk.f32.gmra.mrb[24].mxu0 %vm196_vm1, %v5966_v18 }
  0x8b   : > { %4670 = vmatprep.mubr.msk.f32.mxu1 %vm196_vm1, %v5968_v16  ;;  %4891 = vmatprep.mubr.msk.f32.mxu0 %vm196_vm1, %v5970_v14 }
  0x8e   : > { %4671 = vmatmul.mubr.msk.f32.gmra.mrb[12].mxu1 %vm196_vm1, %v5980_v12  ;;  %4892 = vmatmul.mubr.msk.f32.gmra.mrb[26].mxu0 %vm196_vm1, %v5982_v10 }
  0x8f   : > { %4673 = vmatprep.mubr.msk.f32.mxu1 %vm196_vm1, %v5984_v7  ;;  %4894 = vmatprep.mubr.msk.f32.mxu0 %vm196_vm1, %v5986_v5 }
  0x92   : > { %4674 = vmatmul.mubr.msk.f32.gmra.mrb[14].mxu1 %vm196_vm1, %v5996_v3  ;;  %4895 = vmatmul.mubr.msk.f32.gmra.mrb[28].mxu0 %vm196_vm1, %v5998_v0  ;;  %v6033_v0 = vld [vmem:[%s6627_s1 + $0x20] sm:$0xf] }
  0x93   : > { %4676 = vmatprep.mubr.msk.f32.mxu1 %vm196_vm1, %v6000_v61  ;;  %4897 = vmatprep.mubr.msk.f32.mxu0 %vm196_vm1, %v6002_v59  ;;  %v6028_v59 = vld [vmem:[#allocation2 + $0xf0] sm:$0xff] }
  0x96   : > { %4677 = vmatmul.mubr.msk.f32.gmra.mrb[16].mxu1 %vm196_vm1, %v6012_v31  ;;  %4898 = vmatmul.mubr.msk.f32.gmra.mrb[30].mxu0 %vm196_vm1, %v6014_v56  ;;  %v6043_v56 = vld [vmem:[#allocation2 + $0xf8] sm:$0xff] }
  0x97   : > { %4679 = vmatprep.mubr.msk.f32.mxu1 %vm196_vm1, %v6016_v28  ;;  %4902 = vmatprep.mubr.msk.f32.mxu0 %vm196_vm1, %v5902_v38  ;;  %v6047_v38 = vld [vmem:[#allocation2 + $0x108] sm:$0xff] }
  0x9a   : > { %4680 = vmatmul.mubr.msk.f32.gmra.mrb[18].mxu1 %vm196_vm1, %v6026_v54  ;;  %4903 = vmatmul.mubr.msk.f32.vlgmr.msra.gmra.mrb[0].mxu0 %vm196_vm1, %v5916_v8  ;;  %v6073_v8 = vld [vmem:[#allocation2 + $0x138] sm:$0xff] }
  0x9b   : > { %4951 = vmatpush3.msk.msra.mxu0 %vm480_vm0, %v5771_v63  ;;  %4682 = vmatprep.mubr.msk.f32.mxu1 %vm196_vm1, %v6028_v59  ;;  %v6059_v63 = vld [vmem:[#allocation2 + $0x110] sm:$0xff] }
  0x9c   : > { %4905 = vmatprep.mubr.msk.f32.mxu0 %vm196_vm1, %v5920_v42  ;;  %5000 = vmatprep.subr.msk.mxu0 %vm480_vm0, %v6033_v0  ;;  %v6061_v42 = vld [vmem:[#allocation2 + $0x120] sm:$0xff] }
  0x9e   : > { %4683 = vmatmul.mubr.msk.f32.gmra.mrb[20].mxu1 %vm196_vm1, %v6043_v56  ;;  %4906 = vmatmul.mubr.msk.f32.gmra.mrb[2].mxu0 %vm196_vm1, %v5932_v45  ;;  %v6071_v45 = vld [vmem:[#allocation2 + $0x128] sm:$0xff] }
  0x9f   : > { %4685 = vmatprep.mubr.msk.f32.mxu1 %vm196_vm1, %v6047_v38  ;;  %4908 = vmatprep.mubr.msk.f32.mxu0 %vm196_vm1, %v5936_v47  ;;  %v6085_v47 = vld [vmem:[#allocation2 + $0x150] sm:$0xff] }
  0xa2   : > { %4686 = vmatmul.mubr.msk.f32.gmra.mrb[22].mxu1 %vm196_vm1, %v6059_v63  ;;  %4909 = vmatmul.mubr.msk.f32.gmra.mrb[4].mxu0 %vm196_vm1, %v5948_v58  ;;  %v6083_v58 = vld [vmem:[#allocation2 + $0x140] sm:$0xff] }
  0xa3   : > { %4688 = vmatprep.mubr.msk.f32.mxu1 %vm196_vm1, %v6061_v42  ;;  %4911 = vmatprep.mubr.msk.f32.mxu0 %vm196_vm1, %v5952_v26  ;;  %v6097_v26 = vld [vmem:[#allocation2 + $0x168] sm:$0xff] }
  0xa6   : > { %4689 = vmatmul.mubr.msk.f32.gmra.mrb[24].mxu1 %vm196_vm1, %v6071_v45  ;;  %4912 = vmatmul.mubr.msk.f32.gmra.mrb[6].mxu0 %vm196_vm1, %v5964_v20  ;;  %v6095_v20 = vld [vmem:[#allocation2 + $0x158] sm:$0xff] }
  0xa7   : > { %4691 = vmatprep.mubr.msk.f32.mxu1 %vm196_vm1, %v6073_v8  ;;  %4914 = vmatprep.mubr.msk.f32.mxu0 %vm196_vm1, %v5968_v16  ;;  %v1033_v16 = vld [vmem:[#allocation2 + $0x2] sm:$0xff] }
  0xaa   : > { %4692 = vmatmul.mubr.msk.f32.gmra.mrb[26].mxu1 %vm196_vm1, %v6083_v58  ;;  %4915 = vmatmul.mubr.msk.f32.gmra.mrb[8].mxu0 %vm196_vm1, %v5980_v12  ;;  %v6107_v12 = vld [vmem:[#allocation2 + $0x170] sm:$0xff] }
  0xab   : > { %4694 = vmatprep.mubr.msk.f32.mxu1 %vm196_vm1, %v6085_v47  ;;  %4917 = vmatprep.mubr.msk.f32.mxu0 %vm196_vm1, %v5984_v7 }
  0xae   : > { %4695 = vmatmul.mubr.msk.f32.gmra.mrb[28].mxu1 %vm196_vm1, %v6095_v20  ;;  %4918 = vmatmul.mubr.msk.f32.gmra.mrb[10].mxu0 %vm196_vm1, %v5996_v3  ;;  %v1034_v3 = vld [vmem:[#allocation2 + $0xa] sm:$0xff] }
  0xaf   : > { %4697 = vmatprep.mubr.msk.f32.mxu1 %vm196_vm1, %v6097_v26  ;;  %4920 = vmatprep.mubr.msk.f32.mxu0 %vm196_vm1, %v6000_v61 }
  0xb2   : > { %4698 = vmatmul.mubr.msk.f32.gmra.mrb[30].mxu1 %vm196_vm1, %v6107_v12  ;;  %4921 = vmatmul.mubr.msk.f32.gmra.mrb[12].mxu0 %vm196_vm1, %v6012_v31 }
  0xb3   : > { %4702 = vmatprep.mubr.msk.f32.mxu1 %vm196_vm1, %v1033_v16  ;;  %4923 = vmatprep.mubr.msk.f32.mxu0 %vm196_vm1, %v6016_v28  ;;  %v2625_v16 = vld [vmem:[#allocation2 + $0x1a0] sm:$0xff] }
  0xb6   : > { %4703 = vmatmul.mubr.msk.f32.vlgmr.msra.gmra.mrb[0].mxu1 %vm196_vm1, %v1034_v3  ;;  %4924 = vmatmul.mubr.msk.f32.gmra.mrb[14].mxu0 %vm196_vm1, %v6026_v54  ;;  %v2624_v3 = vld [vmem:[#allocation2 + $0x198] sm:$0xff] }
  0xb7   : > { %4705 = vmatprep.mubr.msk.f32.mxu1 %vm196_vm1, %v5744_v55  ;;  %4926 = vmatprep.mubr.msk.f32.mxu0 %vm196_vm1, %v6028_v59  ;;  %v6167_v55 = vld [vmem:[#allocation2 + $0x180] sm:$0xff] }
  0xb8   : > { %4751 = vmatpush3.msk.msra.mxu1 %vm480_vm0, %v5890_v30  ;;  %v6724_v30 = vld [vmem:[#allocation27_spill] sm:$0xff] }
  0xb9   : > { %5050 = vmatprep.subr.msk.mxu1 %vm480_vm0, %v5555_v2 }
  0xba   : > { %4706 = vmatmul.mubr.msk.f32.gmra.mrb[2].mxu1 %vm196_vm1, %v5762_v60  ;;  %4927 = vmatmul.mubr.msk.f32.gmra.mrb[16].mxu0 %vm196_vm1, %v6043_v56  ;;  %v6177_v60 = vld [vmem:[#allocation2 + $0x188] sm:$0xff] }
  0xbb   : > { %4708 = vmatprep.mubr.msk.f32.mxu1 %vm196_vm1, %v5766_v62  ;;  %4929 = vmatprep.mubr.msk.f32.mxu0 %vm196_vm1, %v6047_v38 }
  0xbe   : > { %4709 = vmatmul.mubr.msk.f32.gmra.mrb[4].mxu1 %vm196_vm1, %v5783_v1  ;;  %4930 = vmatmul.mubr.msk.f32.gmra.mrb[18].mxu0 %vm196_vm1, %v6059_v63 }
  0xbf   : > { %4711 = vmatprep.mubr.msk.f32.mxu1 %vm196_vm1, %v5789_v4  ;;  %4932 = vmatprep.mubr.msk.f32.mxu0 %vm196_vm1, %v6061_v42 }
  0xc2   : > { %4712 = vmatmul.mubr.msk.f32.gmra.mrb[6].mxu1 %vm196_vm1, %v5803_v6  ;;  %4933 = vmatmul.mubr.msk.f32.gmra.mrb[20].mxu0 %vm196_vm1, %v6071_v45 }
  0xc3   : > { %4714 = vmatprep.mubr.msk.f32.mxu1 %vm196_vm1, %v5807_v9  ;;  %4935 = vmatprep.mubr.msk.f32.mxu0 %vm196_vm1, %v6073_v8 }
  0xc6   : > { %4715 = vmatmul.mubr.msk.f32.gmra.mrb[8].mxu1 %vm196_vm1, %v5819_v11  ;;  %4936 = vmatmul.mubr.msk.f32.gmra.mrb[22].mxu0 %vm196_vm1, %v6083_v58 }
  0xc7   : > { %4717 = vmatprep.mubr.msk.f32.mxu1 %vm196_vm1, %v5823_v13  ;;  %4938 = vmatprep.mubr.msk.f32.mxu0 %vm196_vm1, %v6085_v47 }
  0xca   : > { %4718 = vmatmul.mubr.msk.f32.gmra.mrb[10].mxu1 %vm196_vm1, %v5835_v15  ;;  %4939 = vmatmul.mubr.msk.f32.gmra.mrb[24].mxu0 %vm196_vm1, %v6095_v20 }
  0xcb   : > { %4720 = vmatprep.mubr.msk.f32.mxu1 %vm196_vm1, %v5839_v17  ;;  %4941 = vmatprep.mubr.msk.f32.mxu0 %vm196_vm1, %v6097_v26 }
  0xce   : > { %4721 = vmatmul.mubr.msk.f32.gmra.mrb[12].mxu1 %vm196_vm1, %v5851_v19  ;;  %4942 = vmatmul.mubr.msk.f32.gmra.mrb[26].mxu0 %vm196_vm1, %v6107_v12 }
  0xcf   : > { %4723 = vmatprep.mubr.msk.f32.mxu1 %vm196_vm1, %v5855_v21  ;;  %4944 = vmatprep.mubr.msk.f32.mxu0 %vm196_vm1, %v6167_v55 }
  0xd2   : > { %4724 = vmatmul.mubr.msk.f32.gmra.mrb[14].mxu1 %vm196_vm1, %v5867_v23  ;;  %4945 = vmatmul.mubr.msk.f32.gmra.mrb[28].mxu0 %vm196_vm1, %v6177_v60 }
  0xd3   : > { %4726 = vmatprep.mubr.msk.f32.mxu1 %vm196_vm1, %v5869_v25  ;;  %4947 = vmatprep.mubr.msk.f32.mxu0 %vm196_vm1, %v2624_v3  ;;  %v6726_v3 = vld [vmem:[#allocation28_spill] sm:$0xff] }
  0xd6   : > { %4727 = vmatmul.mubr.msk.f32.gmra.mrb[16].mxu1 %vm196_vm1, %v5878_v27  ;;  %4948 = vmatmul.mubr.msk.f32.gmra.mrb[30].mxu0 %vm196_vm1, %v2625_v16  ;;  %v6727_v16 = vld [vmem:[#allocation14_spill] sm:$0xff] }
  0xd7   : > { %4729 = vmatprep.mubr.msk.f32.mxu1 %vm196_vm1, %v5882_v29  ;;  %4952 = vmatprep.mubr.msk.f32.mxu0 %vm196_vm1, %v5632_v32  ;;  %v6710_v32 = vld [vmem:[#allocation34_spill] sm:$0xff] }
  0xda   : > { %4730 = vmatmul.mubr.msk.f32.gmra.mrb[18].mxu1 %vm196_vm1, %v5898_v33  ;;  %4953 = vmatmul.mubr.msk.f32.vlgmr.msra.gmra.mrb[0].mxu0 %vm196_vm1, %v5650_v34  ;;  %v6711_v34 = vld [vmem:[#allocation6_spill] sm:$0xff] }
  0xdb   : > { %5001 = vmatpush3.msk.msra.mxu0 %vm480_vm0, %v6033_v0  ;;  %4732 = vmatprep.mubr.msk.f32.mxu1 %vm196_vm1, %v5904_v39  ;;  %v6723_v0 = vld [vmem:[#allocation12_spill] sm:$0xff] }
  0xdc   : > { %4955 = vmatprep.mubr.msk.f32.mxu0 %vm196_vm1, %v5654_v35  ;;  %v6712_v35 = vld [vmem:[#allocation21_spill] sm:$0xff] }
  0xde   : > { %4733 = vmatmul.mubr.msk.f32.gmra.mrb[20].mxu1 %vm196_vm1, %v5918_v40  ;;  %4956 = vmatmul.mubr.msk.f32.gmra.mrb[2].mxu0 %vm196_vm1, %v5666_v36  ;;  %v6713_v36 = vld [vmem:[#allocation7_spill] sm:$0xff] }
  0xdf   : > { %4735 = vmatprep.mubr.msk.f32.mxu1 %vm196_vm1, %v5922_v44  ;;  %4958 = vmatprep.mubr.msk.f32.mxu0 %vm196_vm1, %v5668_v37  ;;  %v6714_v37 = vld [vmem:[#allocation22_spill] sm:$0xff] }
  0xe2   : > { %4736 = vmatmul.mubr.msk.f32.gmra.mrb[22].mxu1 %vm196_vm1, %v5934_v46  ;;  %4959 = vmatmul.mubr.msk.f32.gmra.mrb[4].mxu0 %vm196_vm1, %v5682_v41  ;;  %v6715_v41 = vld [vmem:[#allocation8_spill] sm:$0xff] }
  0xe3   : > { %4738 = vmatprep.mubr.msk.f32.mxu1 %vm196_vm1, %v5938_v57  ;;  %4961 = vmatprep.mubr.msk.f32.mxu0 %vm196_vm1, %v5687_v43  ;;  %v6716_v43 = vld [vmem:[#allocation23_spill] sm:$0xff] }
  0xe6   : > { %4739 = vmatmul.mubr.msk.f32.gmra.mrb[24].mxu1 %vm196_vm1, %v5950_v24  ;;  %4962 = vmatmul.mubr.msk.f32.gmra.mrb[6].mxu0 %vm196_vm1, %v5705_v48  ;;  %v6717_v48 = vld [vmem:[#allocation9_spill] sm:$0xff] }
  0xe7   : > { %4741 = vmatprep.mubr.msk.f32.mxu1 %vm196_vm1, %v5954_v22  ;;  %4964 = vmatprep.mubr.msk.f32.mxu0 %vm196_vm1, %v5708_v49  ;;  %v6718_v49 = vld [vmem:[#allocation24_spill] sm:$0xff] }
  0xea   : > { %4742 = vmatmul.mubr.msk.f32.gmra.mrb[26].mxu1 %vm196_vm1, %v5966_v18  ;;  %4965 = vmatmul.mubr.msk.f32.gmra.mrb[8].mxu0 %vm196_vm1, %v5718_v50  ;;  %v6719_v50 = vld [vmem:[#allocation10_spill] sm:$0xff] }
  0xeb   : > { %4744 = vmatprep.mubr.msk.f32.mxu1 %vm196_vm1, %v5970_v14  ;;  %4967 = vmatprep.mubr.msk.f32.mxu0 %vm196_vm1, %v5720_v51  ;;  %v6720_v51 = vld [vmem:[#allocation25_spill] sm:$0xff] }
  0xee   : > { %4745 = vmatmul.mubr.msk.f32.gmra.mrb[28].mxu1 %vm196_vm1, %v5982_v10  ;;  %4968 = vmatmul.mubr.msk.f32.gmra.mrb[10].mxu0 %vm196_vm1, %v5730_v52  ;;  %v6721_v52 = vld [vmem:[#allocation11_spill] sm:$0xff] }
  0xef   : > { %4747 = vmatprep.mubr.msk.f32.mxu1 %vm196_vm1, %v5986_v5  ;;  %4970 = vmatprep.mubr.msk.f32.mxu0 %vm196_vm1, %v5732_v53  ;;  %v6722_v53 = vld [vmem:[#allocation26_spill] sm:$0xff] }
  0xf2   : > { %4748 = vmatmul.mubr.msk.f32.gmra.mrb[30].mxu1 %vm196_vm1, %v6710_v32  ;;  %4971 = vmatmul.mubr.msk.f32.gmra.mrb[12].mxu0 %vm196_vm1, %v6711_v34  ;;  %v6728_v34 = vld [vmem:[#allocation29_spill] sm:$0xff] }
  0xf3   : > { %4752 = vmatprep.mubr.msk.f32.mxu1 %vm196_vm1, %v6712_v35  ;;  %4973 = vmatprep.mubr.msk.f32.mxu0 %vm196_vm1, %v6713_v36  ;;  %v6729_v35 = vld [vmem:[#allocation15_spill] sm:$0xff] }
  0xf6   : > { %4753 = vmatmul.mubr.msk.f32.vlgmr.msra.gmra.mrb[0].mxu1 %vm196_vm1, %v6714_v37  ;;  %4974 = vmatmul.mubr.msk.f32.gmra.mrb[14].mxu0 %vm196_vm1, %v6715_v41  ;;  %v6730_v37 = vld [vmem:[#allocation30_spill] sm:$0xff] }
  0xf7   : > { %4755 = vmatprep.mubr.msk.f32.mxu1 %vm196_vm1, %v6716_v43  ;;  %4976 = vmatprep.mubr.msk.f32.mxu0 %vm196_vm1, %v6717_v48  ;;  %v6731_v43 = vld [vmem:[#allocation16_spill] sm:$0xff] }
  0xf8   : > { %5051 = vmatpush3.msk.msra.mxu1 %vm480_vm0, %v5555_v2  ;;  %v6725_v2 = vld [vmem:[#allocation13_spill] sm:$0xff] }
  0xfa   : > { %4756 = vmatmul.mubr.msk.f32.gmra.mrb[2].mxu1 %vm196_vm1, %v6718_v49  ;;  %4977 = vmatmul.mubr.msk.f32.gmra.mrb[16].mxu0 %vm196_vm1, %v6719_v50  ;;  %v6732_v49 = vld [vmem:[#allocation31_spill] sm:$0xff] }
  0xfb   : > { %4758 = vmatprep.mubr.msk.f32.mxu1 %vm196_vm1, %v6720_v51  ;;  %4979 = vmatprep.mubr.msk.f32.mxu0 %vm196_vm1, %v6721_v52  ;;  %v6733_v51 = vld [vmem:[#allocation17_spill] sm:$0xff] }
  0xfe   : > { %4759 = vmatmul.mubr.msk.f32.gmra.mrb[4].mxu1 %vm196_vm1, %v6722_v53  ;;  %4980 = vmatmul.mubr.msk.f32.gmra.mrb[18].mxu0 %vm196_vm1, %v6723_v0  ;;  %v6734_v53 = vld [vmem:[#allocation32_spill] sm:$0xff] }
  0xff   : > { %4761 = vmatprep.mubr.msk.f32.mxu1 %vm196_vm1, %v6724_v30  ;;  %4982 = vmatprep.mubr.msk.f32.mxu0 %vm196_vm1, %v6725_v2  ;;  %v6735_v30 = vld [vmem:[#allocation18_spill] sm:$0xff] }
 0x102   : > { %4762 = vmatmul.mubr.msk.f32.gmra.mrb[6].mxu1 %vm196_vm1, %v6726_v3  ;;  %4983 = vmatmul.mubr.msk.f32.gmra.mrb[20].mxu0 %vm196_vm1, %v6727_v16  ;;  %v6736_v3 = vld [vmem:[#allocation19_spill] sm:$0xff] }
 0x103   : > { %4764 = vmatprep.mubr.msk.f32.mxu1 %vm196_vm1, %v6728_v34  ;;  %4985 = vmatprep.mubr.msk.f32.mxu0 %vm196_vm1, %v6729_v35  ;;  %v6301_v34 = vld [vmem:[#allocation2 + $0x181] sm:$0xff] }
 0x106   : > { %4765 = vmatmul.mubr.msk.f32.gmra.mrb[8].mxu1 %vm196_vm1, %v6730_v37  ;;  %4986 = vmatmul.mubr.msk.f32.gmra.mrb[22].mxu0 %vm196_vm1, %v6731_v43  ;;  %v6737_v37 = vld [vmem:[#allocation33_spill] sm:$0xff] }
 0x107   : > { %4767 = vmatprep.mubr.msk.f32.mxu1 %vm196_vm1, %v6732_v49  ;;  %4988 = vmatprep.mubr.msk.f32.mxu0 %vm196_vm1, %v6733_v51  ;;  %v6738_v49 = vld [vmem:[#allocation20_spill] sm:$0xff] }
 0x10a   : > { %4768 = vmatmul.mubr.msk.f32.gmra.mrb[10].mxu1 %vm196_vm1, %v6734_v53  ;;  %4989 = vmatmul.mubr.msk.f32.gmra.mrb[24].mxu0 %vm196_vm1, %v6735_v30  ;;  %v6311_v53 = vld [vmem:[#allocation2 + $0x189] sm:$0xff] }
 0x10b   : > { %4770 = vmatprep.mubr.msk.f32.mxu1 %vm196_vm1, %v5984_v7  ;;  %4991 = vmatprep.mubr.msk.f32.mxu0 %vm196_vm1, %v6736_v3  ;;  %v3014_v7 = vld [vmem:[#allocation2 + $0x199] sm:$0xff] }
 0x10e   : > { %4771 = vmatmul.mubr.msk.f32.gmra.mrb[12].mxu1 %vm196_vm1, %v6737_v37  ;;  %4992 = vmatmul.mubr.msk.f32.gmra.mrb[26].mxu0 %vm196_vm1, %v6738_v49  ;;  %v3015_v37 = vld [vmem:[#allocation2 + $0x1a1] sm:$0xff] }
 0x10f   : > { %4773 = vmatprep.mubr.msk.f32.mxu1 %vm196_vm1, %v6000_v61  ;;  %4994 = vmatprep.mubr.msk.f32.mxu0 %vm196_vm1, %v6301_v34  ;;  %v3405_v61 = vld [vmem:[#allocation2 + $0x1a2] sm:$0xff] }
 0x112   : > { %4774 = vmatmul.mubr.msk.f32.gmra.mrb[14].mxu1 %vm196_vm1, %v6012_v31  ;;  %4995 = vmatmul.mubr.msk.f32.gmra.mrb[28].mxu0 %vm196_vm1, %v6311_v53 }
 0x113   : > { %4776 = vmatprep.mubr.msk.f32.mxu1 %vm196_vm1, %v6016_v28  ;;  %4997 = vmatprep.mubr.msk.f32.mxu0 %vm196_vm1, %v3014_v7 }
 0x116   : > { %4777 = vmatmul.mubr.msk.f32.gmra.mrb[16].mxu1 %vm196_vm1, %v6026_v54  ;;  %4998 = vmatmul.mubr.msk.f32.gmra.mrb[30].mxu0 %vm196_vm1, %v3015_v37  ;;  %v6739_v54 = vld [vmem:[#allocation35_spill] sm:$0xff] }
 0x117   : > { %4779 = vmatprep.mubr.msk.f32.mxu1 %vm196_vm1, %v6028_v59  ;;  %5002 = vmatprep.mubr.msk.f32.mxu0 %vm196_vm1, %v5766_v62  ;;  %v6740_v59 = vld [vmem:[#allocation36_spill] sm:$0xff] }
 0x11a   : > { %4780 = vmatmul.mubr.msk.f32.gmra.mrb[18].mxu1 %vm196_vm1, %v6043_v56  ;;  %5003 = vmatmul.mubr.msk.f32.vlgmr.msra.gmra.mrb[0].mxu0 %vm196_vm1, %v5783_v1  ;;  %v3404_v56 = vld [vmem:[#allocation2 + $0x19a] sm:$0xff] }
 0x11b   : > { %4782 = vmatprep.mubr.msk.f32.mxu1 %vm196_vm1, %v6047_v38  ;;  %5005 = vmatprep.mubr.msk.f32.mxu0 %vm196_vm1, %v5789_v4 }
 0x11e   : > { %4783 = vmatmul.mubr.msk.f32.gmra.mrb[20].mxu1 %vm196_vm1, %v6059_v63  ;;  %5006 = vmatmul.mubr.msk.f32.gmra.mrb[2].mxu0 %vm196_vm1, %v5803_v6 }
 0x11f   : > { %4785 = vmatprep.mubr.msk.f32.mxu1 %vm196_vm1, %v6061_v42  ;;  %5008 = vmatprep.mubr.msk.f32.mxu0 %vm196_vm1, %v5807_v9 }
 0x122   : > { %4786 = vmatmul.mubr.msk.f32.gmra.mrb[22].mxu1 %vm196_vm1, %v6071_v45  ;;  %5009 = vmatmul.mubr.msk.f32.gmra.mrb[4].mxu0 %vm196_vm1, %v5819_v11 }
 0x123   : > { %4788 = vmatprep.mubr.msk.f32.mxu1 %vm196_vm1, %v6073_v8  ;;  %5011 = vmatprep.mubr.msk.f32.mxu0 %vm196_vm1, %v5823_v13 }
 0x126   : > { %4789 = vmatmul.mubr.msk.f32.gmra.mrb[24].mxu1 %vm196_vm1, %v6083_v58  ;;  %5012 = vmatmul.mubr.msk.f32.gmra.mrb[6].mxu0 %vm196_vm1, %v5835_v15 }
 0x127   : > { %4791 = vmatprep.mubr.msk.f32.mxu1 %vm196_vm1, %v6085_v47  ;;  %5014 = vmatprep.mubr.msk.f32.mxu0 %vm196_vm1, %v5839_v17 }
 0x12a   : > { %4792 = vmatmul.mubr.msk.f32.gmra.mrb[26].mxu1 %vm196_vm1, %v6095_v20  ;;  %5015 = vmatmul.mubr.msk.f32.gmra.mrb[8].mxu0 %vm196_vm1, %v5851_v19 }
 0x12b   : > { %4794 = vmatprep.mubr.msk.f32.mxu1 %vm196_vm1, %v6097_v26  ;;  %5017 = vmatprep.mubr.msk.f32.mxu0 %vm196_vm1, %v5855_v21 }
 0x12e   : > { %4795 = vmatmul.mubr.msk.f32.gmra.mrb[28].mxu1 %vm196_vm1, %v6107_v12  ;;  %5018 = vmatmul.mubr.msk.f32.gmra.mrb[10].mxu0 %vm196_vm1, %v5867_v23 }
 0x12f   : > { %4797 = vmatprep.mubr.msk.f32.mxu1 %vm196_vm1, %v6167_v55  ;;  %5020 = vmatprep.mubr.msk.f32.mxu0 %vm196_vm1, %v5869_v25 }
 0x132   : > { %4798 = vmatmul.mubr.msk.f32.gmra.mrb[30].mxu1 %vm196_vm1, %v6177_v60  ;;  %5021 = vmatmul.mubr.msk.f32.gmra.mrb[12].mxu0 %vm196_vm1, %v5878_v27  ;;  %v6466_v27 = vld [vmem:[%s6629_s3] ss:$0 sm:$0xff] }
 0x133   : > { %4826 = vmatprep.mubr.msk.f32.mxu1 %vm196_vm1, %v6713_v36  ;;  %5023 = vmatprep.mubr.msk.f32.mxu0 %vm196_vm1, %v5882_v29 }
 0x136   : > { %4827 = vmatmul.mubr.msk.f32.vlgmr.msra.gmra.mrb[16].mxu1 %vm196_vm1, %v6715_v41  ;;  %5024 = vmatmul.mubr.msk.f32.gmra.mrb[14].mxu0 %vm196_vm1, %v5898_v33 }
 0x137   : > { %4829 = vmatprep.mubr.msk.f32.mxu1 %vm196_vm1, %v6717_v48  ;;  %5026 = vmatprep.mubr.msk.f32.mxu0 %vm196_vm1, %v5904_v39 }
 0x13a   : > { %4830 = vmatmul.mubr.msk.f32.gmra.mrb[18].mxu1 %vm196_vm1, %v6719_v50  ;;  %5027 = vmatmul.mubr.msk.f32.gmra.mrb[16].mxu0 %vm196_vm1, %v5918_v40 }
 0x13b   : > { %4832 = vmatprep.mubr.msk.f32.mxu1 %vm196_vm1, %v6721_v52  ;;  %5029 = vmatprep.mubr.msk.f32.mxu0 %vm196_vm1, %v5922_v44 }
 0x13e   : > { %4833 = vmatmul.mubr.msk.f32.gmra.mrb[20].mxu1 %vm196_vm1, %v6723_v0  ;;  %5030 = vmatmul.mubr.msk.f32.gmra.mrb[18].mxu0 %vm196_vm1, %v5934_v46 }
 0x13f   : > { %4835 = vmatprep.mubr.msk.f32.mxu1 %vm196_vm1, %v6725_v2  ;;  %5032 = vmatprep.mubr.msk.f32.mxu0 %vm196_vm1, %v5938_v57 }
 0x142   : > { %4836 = vmatmul.mubr.msk.f32.gmra.mrb[22].mxu1 %vm196_vm1, %v6727_v16  ;;  %5033 = vmatmul.mubr.msk.f32.gmra.mrb[20].mxu0 %vm196_vm1, %v5950_v24 }
 0x143   : > { %4838 = vmatprep.mubr.msk.f32.mxu1 %vm196_vm1, %v6729_v35  ;;  %5035 = vmatprep.mubr.msk.f32.mxu0 %vm196_vm1, %v5954_v22  ;;  %v6461_v22 = vld [vmem:[%s6628_s2] ss:$0 sm:$0xff] }
 0x146   : > { %4839 = vmatmul.mubr.msk.f32.gmra.mrb[24].mxu1 %vm196_vm1, %v6731_v43  ;;  %5036 = vmatmul.mubr.msk.f32.gmra.mrb[22].mxu0 %vm196_vm1, %v5966_v18 }
 0x147   : > { %4841 = vmatprep.mubr.msk.f32.mxu1 %vm196_vm1, %v6733_v51  ;;  %5038 = vmatprep.mubr.msk.f32.mxu0 %vm196_vm1, %v5970_v14 }
 0x14a   : > { %4842 = vmatmul.mubr.msk.f32.gmra.mrb[26].mxu1 %vm196_vm1, %v6735_v30  ;;  %5039 = vmatmul.mubr.msk.f32.gmra.mrb[24].mxu0 %vm196_vm1, %v5982_v10 }
 0x14b   : > { %4844 = vmatprep.mubr.msk.f32.mxu1 %vm196_vm1, %v6736_v3  ;;  %5041 = vmatprep.mubr.msk.f32.mxu0 %vm196_vm1, %v5986_v5 }
 0x14e   : > { %4845 = vmatmul.mubr.msk.f32.gmra.mrb[28].mxu1 %vm196_vm1, %v6738_v49  ;;  %5042 = vmatmul.mubr.msk.f32.gmra.mrb[26].mxu0 %vm196_vm1, %v6710_v32 }
 0x14f   : > { %4847 = vmatprep.mubr.msk.f32.mxu1 %vm196_vm1, %v6301_v34  ;;  %5044 = vmatprep.mubr.msk.f32.mxu0 %vm196_vm1, %v6739_v54 }
 0x152   : > { %4848 = vmatmul.mubr.msk.f32.gmra.mrb[30].mxu1 %vm196_vm1, %v6311_v53  ;;  %5045 = vmatmul.mubr.msk.f32.gmra.mrb[28].mxu0 %vm196_vm1, %v6740_v59 }
 0x153   : > { %5047 = vmatprep.mubr.msk.f32.mxu0 %vm196_vm1, %v3404_v56 }
 0x156   : > { %5048 = vmatmul.mubr.msk.f32.gmra.mrb[30].mxu0 %vm196_vm1, %v3405_v61 }
 0x1c9   : > { %v4754_v62 = vpop.f32.mrb[0].mxu1 }
 0x1ca   : > { %v1622_v1 = vpop.f32.mrb[1].mxu1 }
 0x1cd   : > { %v4757_v4 = vpop.f32.mrb[2].mxu1 }
 0x1ce   : > { %v1632_v5 = vpop.f32.mrb[3].mxu1 }
 0x1d1   : > { %v4760_v6 = vpop.f32.mrb[4].mxu1 }
 0x1d2   : > { %v1642_v9 = vpop.f32.mrb[5].mxu1 }
 0x1d5   : > { %v4763_v10 = vpop.f32.mrb[6].mxu1 }
 0x1d6   : > { %v1652_v11 = vpop.f32.mrb[7].mxu1 }
 0x1d9   : > { %v4766_v12 = vpop.f32.mrb[8].mxu1 }
 0x1da   : > { %v1662_v13 = vpop.f32.mrb[9].mxu1 }
 0x1dd   : > { %v6445_v14 = vpop.f32.mrb[10].mxu1 }
 0x1de   : > { %v6447_v15 = vpop.f32.mrb[11].mxu1 }
 0x1e1   : > { %v6449_v17 = vpop.f32.mrb[12].mxu1 }
 0x1e2   : > { %v6451_v18 = vpop.f32.mrb[13].mxu1 }
 0x1e5   : > { %v6453_v19 = vpop.f32.mrb[14].mxu1 }
 0x1e6   : > { %v6455_v20 = vpop.f32.mrb[15].mxu1 }
 0x1ed   : > { %v5004_v21 = vpop.f32.mrb[0].mxu0 }
 0x1ee   : > { %v5052_v23 = vadd.f32 %v5004_v21, %v4754_v62  ;;  %v3573_v25 = vpop.f32.mrb[1].mxu0 }
 0x1ef   : > { %v5053_v28 = vadd.f32 %v3573_v25, %v1622_v1 }
 0x1f0   : > { %v3772_v29 = vmul.f32 %v5052_v23, %v6461_v22 }
 0x1f1   : > { %v3771_v31 = vmul.f32 %v5053_v28, %v6461_v22  ;;  %v5007_v33 = vpop.f32.mrb[2].mxu0 }
 0x1f2   : > { %v3811_v38 = vadd.f32 %v6466_v27, %v3772_v29  ;;  %v5054_v39 = vadd.f32 %v5007_v33, %v4757_v4  ;;  %v3583_v8 = vpop.f32.mrb[3].mxu0 }
 0x1f3   : > { %v3810_v40 = vadd.f32 %v6466_v27, %v3771_v31  ;;  %v5055_v42 = vadd.f32 %v3583_v8, %v1632_v5 }
 0x1f4   : > { %v3843_v44 = vmax.f32 %v3811_v38, 0.0  ;;  %v3774_v45 = vmul.f32 %v5054_v39, %v6461_v22 }
 0x1f5   : > { %v3842_v46 = vmax.f32 %v3810_v40, 0.0  ;;  %v3773_v47 = vmul.f32 %v5055_v42, %v6461_v22  ;;  %v5010_v57 = vpop.f32.mrb[4].mxu0 }
 0x1f6   : > { %3875 = vst [vmem:[%s6476_s13 + $0x8] sm:$0xff] %v3843_v44  ;;  %v3813_v58 = vadd.f32 %v6466_v27, %v3774_v45  ;;  %v5056_v24 = vadd.f32 %v5010_v57, %v4760_v6  ;;  %v3593_v26 = vpop.f32.mrb[5].mxu0 }
 0x1f7   : > { %3874 = vst [vmem:[%s6476_s13] sm:$0xff] %v3842_v46  ;;  %v3812_v63 = vadd.f32 %v6466_v27, %v3773_v47  ;;  %v5057_v55 = vadd.f32 %v3593_v26, %v1642_v9 }
 0x1f8   : > { %v3845_v60 = vmax.f32 %v3813_v58, 0.0  ;;  %v3776_v32 = vmul.f32 %v5056_v24, %v6461_v22 }
 0x1f9   : > { %v3844_v36 = vmax.f32 %v3812_v63, 0.0  ;;  %v3775_v41 = vmul.f32 %v5057_v55, %v6461_v22  ;;  %v5013_v48 = vpop.f32.mrb[6].mxu0 }
 0x1fa   : > { %3877 = vst [vmem:[%s6476_s13 + $0x18] sm:$0xff] %v3845_v60  ;;  %v3815_v50 = vadd.f32 %v6466_v27, %v3776_v32  ;;  %v5058_v52 = vadd.f32 %v5013_v48, %v4763_v10  ;;  %v3603_v0 = vpop.f32.mrb[7].mxu0 }
 0x1fb   : > { %3876 = vst [vmem:[%s6476_s13 + $0x10] sm:$0xff] %v3844_v36  ;;  %v3814_v2 = vadd.f32 %v6466_v27, %v3775_v41  ;;  %v5059_v16 = vadd.f32 %v3603_v0, %v1652_v11 }
 0x1fc   : > { %v3847_v35 = vmax.f32 %v3815_v50, 0.0  ;;  %v3778_v43 = vmul.f32 %v5058_v52, %v6461_v22 }
 0x1fd   : > { %v3846_v51 = vmax.f32 %v3814_v2, 0.0  ;;  %v3777_v30 = vmul.f32 %v5059_v16, %v6461_v22  ;;  %v5016_v3 = vpop.f32.mrb[8].mxu0 }
 0x1fe   : > { %3879 = vst [vmem:[%s6476_s13 + $0x28] sm:$0xff] %v3847_v35  ;;  %v3817_v34 = vadd.f32 %v6466_v27, %v3778_v43  ;;  %v5060_v49 = vadd.f32 %v5016_v3, %v4766_v12  ;;  %v3613_v53 = vpop.f32.mrb[9].mxu0 }
 0x1ff   : > { %3878 = vst [vmem:[%s6476_s13 + $0x20] sm:$0xff] %v3846_v51  ;;  %v3816_v7 = vadd.f32 %v6466_v27, %v3777_v30  ;;  %v5061_v37 = vadd.f32 %v3613_v53, %v1662_v13 }
 0x200   : > { %v3849_v54 = vmax.f32 %v3817_v34, 0.0  ;;  %v3780_v56 = vmul.f32 %v5060_v49, %v6461_v22 }
 0x201   : > { %v3848_v59 = vmax.f32 %v3816_v7, 0.0  ;;  %v3779_v61 = vmul.f32 %v5061_v37, %v6461_v22  ;;  %v5019_v62 = vpop.f32.mrb[10].mxu0 }
 0x202   : > { %3881 = vst [vmem:[%s6476_s13 + $0x38] sm:$0xff] %v3849_v54  ;;  %v3819_v1 = vadd.f32 %v6466_v27, %v3780_v56  ;;  %v5062_v4 = vadd.f32 %v5019_v62, %v6445_v14  ;;  %v3623_v5 = vpop.f32.mrb[11].mxu0 }
 0x203   : > { %3880 = vst [vmem:[%s6476_s13 + $0x30] sm:$0xff] %v3848_v59  ;;  %v3818_v6 = vadd.f32 %v6466_v27, %v3779_v61  ;;  %v5063_v9 = vadd.f32 %v3623_v5, %v6447_v15 }
 0x204   : > { %v3851_v10 = vmax.f32 %v3819_v1, 0.0  ;;  %v3782_v11 = vmul.f32 %v5062_v4, %v6461_v22 }
 0x205   : > { %v3850_v12 = vmax.f32 %v3818_v6, 0.0  ;;  %v3781_v13 = vmul.f32 %v5063_v9, %v6461_v22  ;;  %v5022_v21 = vpop.f32.mrb[12].mxu0 }
 0x206   : > { %3883 = vst [vmem:[%s6476_s13 + $0x48] sm:$0xff] %v3851_v10  ;;  %v3821_v23 = vadd.f32 %v6466_v27, %v3782_v11  ;;  %v5064_v25 = vadd.f32 %v5022_v21, %v6449_v17  ;;  %v3633_v14 = vpop.f32.mrb[13].mxu0 }
 0x207   : > { %3882 = vst [vmem:[%s6476_s13 + $0x40] sm:$0xff] %v3850_v12  ;;  %v3820_v28 = vadd.f32 %v6466_v27, %v3781_v13  ;;  %v5065_v15 = vadd.f32 %v3633_v14, %v6451_v18 }
 0x208   : > { %v3853_v29 = vmax.f32 %v3821_v23, 0.0  ;;  %v3784_v31 = vmul.f32 %v5064_v25, %v6461_v22 }
 0x209   : > { %v3852_v33 = vmax.f32 %v3820_v28, 0.0  ;;  %v3783_v38 = vmul.f32 %v5065_v15, %v6461_v22  ;;  %v4828_v39 = vpop.f32.mrb[16].mxu1  ;;  %v5025_v8 = vpop.f32.mrb[14].mxu0 }
 0x20a   : > { %3885 = vst [vmem:[%s6476_s13 + $0x58] sm:$0xff] %v3853_v29  ;;  %v3823_v40 = vadd.f32 %v6466_v27, %v3784_v31  ;;  %v5066_v17 = vadd.f32 %v5025_v8, %v6453_v19  ;;  %v2092_v42 = vpop.f32.mrb[17].mxu1  ;;  %v3643_v44 = vpop.f32.mrb[15].mxu0 }
 0x20b   : > { %3884 = vst [vmem:[%s6476_s13 + $0x50] sm:$0xff] %v3852_v33  ;;  %v3822_v18 = vadd.f32 %v6466_v27, %v3783_v38  ;;  %v5067_v45 = vadd.f32 %v3643_v44, %v6455_v20 }
 0x20c   : > { %v3855_v46 = vmax.f32 %v3823_v40, 0.0  ;;  %v3786_v47 = vmul.f32 %v5066_v17, %v6461_v22 }
 0x20d   : > { %v3854_v57 = vmax.f32 %v3822_v18, 0.0  ;;  %v3785_v58 = vmul.f32 %v5067_v45, %v6461_v22  ;;  %v4831_v24 = vpop.f32.mrb[18].mxu1  ;;  %v5028_v26 = vpop.f32.mrb[16].mxu0 }
 0x20e   : > { %3887 = vst [vmem:[%s6476_s13 + $0x68] sm:$0xff] %v3855_v46  ;;  %v3825_v19 = vadd.f32 %v6466_v27, %v3786_v47  ;;  %v5068_v63 = vadd.f32 %v5028_v26, %v4828_v39  ;;  %v2102_v55 = vpop.f32.mrb[19].mxu1  ;;  %v3653_v60 = vpop.f32.mrb[17].mxu0 }
 0x20f   : > { %3886 = vst [vmem:[%s6476_s13 + $0x60] sm:$0xff] %v3854_v57  ;;  %v3824_v32 = vadd.f32 %v6466_v27, %v3785_v58  ;;  %v5069_v20 = vadd.f32 %v3653_v60, %v2092_v42 }
 0x210   : > { %v3857_v36 = vmax.f32 %v3825_v19, 0.0  ;;  %v3788_v41 = vmul.f32 %v5068_v63, %v6461_v22 }
 0x211   : > { %v3856_v48 = vmax.f32 %v3824_v32, 0.0  ;;  %v3787_v50 = vmul.f32 %v5069_v20, %v6461_v22  ;;  %v4834_v52 = vpop.f32.mrb[20].mxu1  ;;  %v5031_v0 = vpop.f32.mrb[18].mxu0 }
 0x212   : > { %3889 = vst [vmem:[%s6476_s13 + $0x78] sm:$0xff] %v3857_v36  ;;  %v3827_v2 = vadd.f32 %v6466_v27, %v3788_v41  ;;  %v5070_v16 = vadd.f32 %v5031_v0, %v4831_v24  ;;  %v2112_v35 = vpop.f32.mrb[21].mxu1  ;;  %v3663_v43 = vpop.f32.mrb[19].mxu0 }
 0x213   : > { %3888 = vst [vmem:[%s6476_s13 + $0x70] sm:$0xff] %v3856_v48  ;;  %v3826_v51 = vadd.f32 %v6466_v27, %v3787_v50  ;;  %v5071_v30 = vadd.f32 %v3663_v43, %v2102_v55 }
 0x214   : > { %v3859_v3 = vmax.f32 %v3827_v2, 0.0  ;;  %v3790_v34 = vmul.f32 %v5070_v16, %v6461_v22 }
 0x215   : > { %v3858_v49 = vmax.f32 %v3826_v51, 0.0  ;;  %v3789_v53 = vmul.f32 %v5071_v30, %v6461_v22  ;;  %v4837_v7 = vpop.f32.mrb[22].mxu1  ;;  %v5034_v37 = vpop.f32.mrb[20].mxu0 }
 0x216   : > { %3891 = vst [vmem:[%s6476_s13 + $0x88] sm:$0xff] %v3859_v3  ;;  %v3829_v54 = vadd.f32 %v6466_v27, %v3790_v34  ;;  %v5072_v56 = vadd.f32 %v5034_v37, %v4834_v52  ;;  %v2122_v59 = vpop.f32.mrb[23].mxu1  ;;  %v3673_v61 = vpop.f32.mrb[21].mxu0 }
 0x217   : > { %3890 = vst [vmem:[%s6476_s13 + $0x80] sm:$0xff] %v3858_v49  ;;  %v3828_v62 = vadd.f32 %v6466_v27, %v3789_v53  ;;  %v5073_v1 = vadd.f32 %v3673_v61, %v2112_v35 }
 0x218   : > { %v3861_v4 = vmax.f32 %v3829_v54, 0.0  ;;  %v3792_v5 = vmul.f32 %v5072_v56, %v6461_v22 }
 0x219   : > { %v3860_v6 = vmax.f32 %v3828_v62, 0.0  ;;  %v3791_v9 = vmul.f32 %v5073_v1, %v6461_v22  ;;  %v4840_v10 = vpop.f32.mrb[24].mxu1  ;;  %v5037_v11 = vpop.f32.mrb[22].mxu0 }
 0x21a   : > { %3893 = vst [vmem:[%s6476_s13 + $0x98] sm:$0xff] %v3861_v4  ;;  %v3831_v12 = vadd.f32 %v6466_v27, %v3792_v5  ;;  %v5074_v13 = vadd.f32 %v5037_v11, %v4837_v7  ;;  %v2132_v21 = vpop.f32.mrb[25].mxu1  ;;  %v3683_v23 = vpop.f32.mrb[23].mxu0 }
 0x21b   : > { %3892 = vst [vmem:[%s6476_s13 + $0x90] sm:$0xff] %v3860_v6  ;;  %v3830_v25 = vadd.f32 %v6466_v27, %v3791_v9  ;;  %v5075_v14 = vadd.f32 %v3683_v23, %v2122_v59 }
 0x21c   : > { %v3863_v28 = vmax.f32 %v3831_v12, 0.0  ;;  %v3794_v15 = vmul.f32 %v5074_v13, %v6461_v22 }
 0x21d   : > { %v3862_v29 = vmax.f32 %v3830_v25, 0.0  ;;  %v3793_v31 = vmul.f32 %v5075_v14, %v6461_v22  ;;  %v4843_v33 = vpop.f32.mrb[26].mxu1  ;;  %v5040_v38 = vpop.f32.mrb[24].mxu0 }
 0x21e   : > { %3895 = vst [vmem:[%s6476_s13 + $0xa8] sm:$0xff] %v3863_v28  ;;  %v3833_v39 = vadd.f32 %v6466_v27, %v3794_v15  ;;  %v5076_v8 = vadd.f32 %v5040_v38, %v4840_v10  ;;  %v2142_v40 = vpop.f32.mrb[27].mxu1  ;;  %v3693_v17 = vpop.f32.mrb[25].mxu0 }
 0x21f   : > { %3894 = vst [vmem:[%s6476_s13 + $0xa0] sm:$0xff] %v3862_v29  ;;  %v3832_v42 = vadd.f32 %v6466_v27, %v3793_v31  ;;  %v5077_v44 = vadd.f32 %v3693_v17, %v2132_v21 }
 0x220   : > { %v3865_v18 = vmax.f32 %v3833_v39, 0.0  ;;  %v3796_v45 = vmul.f32 %v5076_v8, %v6461_v22 }
 0x221   : > { %v3864_v46 = vmax.f32 %v3832_v42, 0.0  ;;  %v3795_v47 = vmul.f32 %v5077_v44, %v6461_v22  ;;  %v4846_v57 = vpop.f32.mrb[28].mxu1  ;;  %v5043_v58 = vpop.f32.mrb[26].mxu0 }
 0x222   : > { %3897 = vst [vmem:[%s6476_s13 + $0xb8] sm:$0xff] %v3865_v18  ;;  %v3835_v24 = vadd.f32 %v6466_v27, %v3796_v45  ;;  %v5078_v26 = vadd.f32 %v5043_v58, %v4843_v33  ;;  %v2152_v19 = vpop.f32.mrb[29].mxu1  ;;  %v3703_v63 = vpop.f32.mrb[27].mxu0 }
 0x223   : > { %3896 = vst [vmem:[%s6476_s13 + $0xb0] sm:$0xff] %v3864_v46  ;;  %v3834_v55 = vadd.f32 %v6466_v27, %v3795_v47  ;;  %v5079_v60 = vadd.f32 %v3703_v63, %v2142_v40 }
 0x224   : > { %v3867_v32 = vmax.f32 %v3835_v24, 0.0  ;;  %v3798_v20 = vmul.f32 %v5078_v26, %v6461_v22 }
 0x225   : > { %v3866_v36 = vmax.f32 %v3834_v55, 0.0  ;;  %v3797_v41 = vmul.f32 %v5079_v60, %v6461_v22  ;;  %v4849_v48 = vpop.f32.mrb[30].mxu1  ;;  %v5046_v50 = vpop.f32.mrb[28].mxu0 }
 0x226   : > { %3899 = vst [vmem:[%s6476_s13 + $0xc8] sm:$0xff] %v3867_v32  ;;  %v3837_v52 = vadd.f32 %v6466_v27, %v3798_v20  ;;  %v5080_v0 = vadd.f32 %v5046_v50, %v4846_v57  ;;  %v2162_v2 = vpop.f32.mrb[31].mxu1  ;;  %v3713_v16 = vpop.f32.mrb[29].mxu0 }
 0x227   : > { %3898 = vst [vmem:[%s6476_s13 + $0xc0] sm:$0xff] %v3866_v36  ;;  %v3836_v35 = vadd.f32 %v6466_v27, %v3797_v41  ;;  %v5081_v43 = vadd.f32 %v3713_v16, %v2152_v19 }
 0x228   : > { %v3869_v51 = vmax.f32 %v3837_v52, 0.0  ;;  %v3800_v30 = vmul.f32 %v5080_v0, %v6461_v22 }
 0x229   : > { %v3868_v3 = vmax.f32 %v3836_v35, 0.0  ;;  %v3799_v34 = vmul.f32 %v5081_v43, %v6461_v22  ;;  %v5049_v49 = vpop.f32.mrb[30].mxu0 }
 0x22a   : > { %3901 = vst [vmem:[%s6476_s13 + $0xd8] sm:$0xff] %v3869_v51  ;;  %v3839_v53 = vadd.f32 %v6466_v27, %v3800_v30  ;;  %v5082_v7 = vadd.f32 %v5049_v49, %v4849_v48  ;;  %v3723_v37 = vpop.f32.mrb[31].mxu0 }
 0x22b   : > { %3900 = vst [vmem:[%s6476_s13 + $0xd0] sm:$0xff] %v3868_v3  ;;  %v3838_v54 = vadd.f32 %v6466_v27, %v3799_v34  ;;  %v5083_v56 = vadd.f32 %v3723_v37, %v2162_v2 }
 0x22c   : > { %v3871_v59 = vmax.f32 %v3839_v53, 0.0  ;;  %v3802_v61 = vmul.f32 %v5082_v7, %v6461_v22 }
 0x22d   : > { %v3870_v62 = vmax.f32 %v3838_v54, 0.0  ;;  %v3801_v1 = vmul.f32 %v5083_v56, %v6461_v22 }
 0x22e   : > { %3903 = vst [vmem:[%s6476_s13 + $0xe8] sm:$0xff] %v3871_v59  ;;  %v3841_v4 = vadd.f32 %v6466_v27, %v3802_v61 }
 0x22f   : > { %3902 = vst [vmem:[%s6476_s13 + $0xe0] sm:$0xff] %v3870_v62  ;;  %v3840_v5 = vadd.f32 %v6466_v27, %v3801_v1 }
 0x230   : > { %v3873_v6 = vmax.f32 %v3841_v4, 0.0 }
 0x231   : > { %v3872_v22 = vmax.f32 %v3840_v5, 0.0 }
 0x232   : > { %3905 = vst [vmem:[%s6476_s13 + $0xf8] sm:$0xff] %v3873_v6 }
 0x233   : > { %3904 = vst [vmem:[%s6476_s13 + $0xf0] sm:$0xff] %v3872_v22 }
 0x234   : > { %5363 = shalt.err (!%p5360_p3)
}
 0x235   : > { %s5364_s6 = scalar_lea.hbm %s6577_s27, 4096  ;;  %s5368_s9 = scalar_lea.hbm %s6630_s4, 8192 }
 0x236   : > { %p5365_p4 = scmp.ne.s32.totalorder %s6577_s27, %s5364_s6  ;;  %p5369_p9 = scmp.lt.u32.totalorder %s6577_s27, %s6630_s4 }
 0x237   : > { %p5370_p10 = scmp.lt.u32.totalorder %s5368_s9, %s5364_s6  ;;  %p5372_p12 = scmp.lt.u32.totalorder %s5364_s6, %s6577_s27 }
 0x238   : > { %p5366_p7 = pnand %p5365_p4, %p5481_p5 }
 0x239   : > { %p5371_p11 = por %p5370_p10, %p5369_p9 }
 0x23a   : > { %p5367_p8 = pneg %p5366_p7 }
 0x23b   : > { %p5373_p13 = por %p5372_p12, %p5371_p11 }
 0x23d   : > { %p5374_p0 = pnand %p5373_p13, %p5367_p8 }
 0x23f   : > { %5377 = shalt.err (!%p5374_p0)
}
 0x240   : > { %s5416_s12 = smov 128   ;;  %s5417_s13 = smov 8  }
 0x241   : > { %5308 = dma.vmem_to_hbm [thread:$0]  (%p5481_p5), %s6579_s20, 4096, %s6577_s27, %s6585_s19, %s5416_s12, %s5416_s12, %s5417_s13  }
 0x242 PF: > { %p5314_p1 = scmp.ge.s32.totalorder %s5412_s18, 2  ;;  %s3935_s14 = sand.u32 1, %s5400_s15  }
 0x243   : > { %s3936_s22 = scalar_lea.sflag [#allocation4], %s3935_s14 }
 0x244   : > { %p5311_p2 = pnand %p5314_p1, %p5485_p6 }
 0x246   : > { %5395 = dma.done.wait (!%p5311_p2), %s3936_s22, 4096  }
 0x247   : > { %5397 = vsyncadd (!%p5311_p2), %s3936_s22, 4294963200  ;;  %p14_p3 = scmp.ge.s32.totalorder %s5468_s21, 4   ;;  %s6741_s15 = smov %s5404_s16 }
 0x248   : > { %s6742_s16 = smov %s5408_s17  ;;  %s6743_s17 = smov %s5479_s24 }
 0x249   : > { %s6744_s18 = smov %s5468_s21  ;;  %16 = sbr.rel (!%p14_p3) target bundleno = 3 (0x3), region = 81 }
 0x250   :  { %3941 = vsyncpa [#allocation4], 1 }
 0x251   :  { %3943 = vsyncpa [#allocation4 + $0x1], 1 }

</bundles_post_ra>
